<compile_context>
chip_gen: v6e
topology: v6e:2x2x1
jax: 0.10.0
libtpu: 0.0.40
codegen_flags: <defaults>
</compile_context>

<pallas_src>
import functools

import jax
import jax.numpy as jnp
from jax.experimental import pallas as pl
from jax.experimental.pallas import tpu as pltpu


def _round_up(x, m):
    return ((x + m - 1) // m) * m


def _betanet_kernel(h0_ref, y_ref,
                    wih0_ref, whh0_ref, bih0_ref, bhh0_ref,
                    wihr_ref, whhr_ref, bihr_ref, bhhr_ref,
                    w1h_ref, w1y_ref, b1_ref,
                    wh_ref, bh_ref, wo_ref, bo_ref,
                    hout_ref, beta_ref,
                    *, gru_layers, gru_hidden, seq_len, n_in, n_hidden_linear):
    L, H, T = gru_layers, gru_hidden, seq_len
    f32 = jnp.float32

    yv = y_ref[...]                                  # (TILE_B, T * n_in)

    # ---------------- GRU branch: h_out = GRU(Y, h0) ----------------
    # layer-0 inputs = per-timestep lane slices of Y (static slices, no copies)
    seq = [yv[:, t * n_in:(t + 1) * n_in] for t in range(T)]
    for l in range(L):
        if l == 0:
            w_ih, w_hh = wih0_ref[...], whh0_ref[...]
            b_ih, b_hh = bih0_ref[...], bhh0_ref[...]
        else:
            w_ih, w_hh = wihr_ref[l - 1], whhr_ref[l - 1]
            b_ih, b_hh = bihr_ref[l - 1], bhhr_ref[l - 1]
        h_state = h0_ref[l]                          # (TILE_B, H)
        new_seq = []
        for t in range(T):
            gi = jnp.dot(seq[t], w_ih, preferred_element_type=f32) + b_ih
            gh = jnp.dot(h_state, w_hh, preferred_element_type=f32) + b_hh
            r = jax.nn.sigmoid(gi[:, 0:H] + gh[:, 0:H])
            z = jax.nn.sigmoid(gi[:, H:2 * H] + gh[:, H:2 * H])
            n = jnp.tanh(gi[:, 2 * H:3 * H] + r * gh[:, 2 * H:3 * H])
            h_state = (1.0 - z) * n + z * h_state    # PyTorch GRU cell
            new_seq.append(h_state)
        hout_ref[l] = h_state.astype(hout_ref.dtype)
        seq = new_seq

    # ------------- MLP branch (uses the ORIGINAL h0 and Y) -------------
    # concat(h_flat, y_flat) @ W1 computed as a sum of per-chunk matmuls.
    acc = jnp.dot(yv, w1y_ref[...], preferred_element_type=f32)
    for l in range(L):
        acc = acc + jnp.dot(h0_ref[l], w1h_ref[l], preferred_element_type=f32)
    acc = acc + b1_ref[...]
    x = acc * jax.nn.sigmoid(acc)                    # SiLU
    for l in range(n_hidden_linear):
        z = jnp.dot(x, wh_ref[l], preferred_element_type=f32) + bh_ref[l]
        x = z * jax.nn.sigmoid(z)                    # SiLU
    logits = jnp.dot(x, wo_ref[...], preferred_element_type=f32) + bo_ref[...]

    # softmax over the feature axis (PyTorch dim=1 on a 2-D input)
    m = jnp.max(logits, axis=-1, keepdims=True)
    e = jnp.exp(logits - m)
    beta = e * pl.reciprocal(jnp.sum(e, axis=-1, keepdims=True), approx=False)
    beta_ref[...] = beta.astype(beta_ref.dtype)


def betanet_forward(h, Y, params, *, tile_b=256):
    """Pallas forward of betaNet. h: (L, B, H) GRU init state, Y: (B, T, nIn)."""
    (wih0, whh0, bih0, bhh0, wihr, whhr, bihr, bhhr,
     w1h, w1y, b1, wh, bh, wo, bo) = params

    L, B, H = h.shape
    _, T, n_in = Y.shape
    HID = b1.shape[-1]
    n_out = wo.shape[-1]
    n_hidden_linear = wh.shape[0]

    h = h.astype(jnp.float32)
    y2 = Y.reshape(B, T * n_in).astype(jnp.float32)   # trailing-dim flatten only

    # batch tile: multiple of 8 sublanes; pad batch to a multiple of the tile
    tile = _round_up(min(tile_b, _round_up(B, 8)), 8)
    b_pad = _round_up(B, tile)
    if b_pad != B:
        h = jnp.pad(h, ((0, 0), (0, b_pad - B), (0, 0)))
        y2 = jnp.pad(y2, ((0, b_pad - B), (0, 0)))
    grid = (b_pad // tile,)

    def batch3(i):
        return (0, i, 0)

    def batch2(i):
        return (i, 0)

    def const2(i):
        return (0, 0)

    def const3(i):
        return (0, 0, 0)

    in_specs = [
        pl.BlockSpec((L, tile, H), batch3),          # h0  (streamed per tile)
        pl.BlockSpec((tile, T * n_in), batch2),      # Y   (streamed per tile)
        pl.BlockSpec(wih0.shape, const2),            # weights: resident in VMEM
        pl.BlockSpec(whh0.shape, const2),
        pl.BlockSpec(bih0.shape, const2),
        pl.BlockSpec(bhh0.shape, const2),
        pl.BlockSpec(wihr.shape, const3),
        pl.BlockSpec(whhr.shape, const3),
        pl.BlockSpec(bihr.shape, const3),
        pl.BlockSpec(bhhr.shape, const3),
        pl.BlockSpec(w1h.shape, const3),
        pl.BlockSpec(w1y.shape, const2),
        pl.BlockSpec(b1.shape, const2),
        pl.BlockSpec(wh.shape, const3),
        pl.BlockSpec(bh.shape, const3),
        pl.BlockSpec(wo.shape, const2),
        pl.BlockSpec(bo.shape, const2),
    ]
    out_specs = [
        pl.BlockSpec((L, tile, H), batch3),          # h_out
        pl.BlockSpec((tile, n_out), batch2),         # beta
    ]
    out_shape = [
        jax.ShapeDtypeStruct((L, b_pad, H), jnp.float32),
        jax.ShapeDtypeStruct((b_pad, n_out), jnp.float32),
    ]

    # advisory cost estimate so XLA schedules this call sensibly
    h3 = 3 * H
    n_in_mlp = L * H + T * n_in
    flops = b_pad * T * (2 * n_in * h3 + 2 * H * h3 + 12 * H)
    flops += b_pad * T * (L - 1) * (4 * H * h3 + 12 * H)
    flops += b_pad * (2 * n_in_mlp * HID + n_hidden_linear * 2 * HID * HID
                      + 2 * HID * n_out + 6 * HID * (n_hidden_linear + 1) + 5 * n_out)
    transcendentals = b_pad * (T * L * 3 * H + (n_hidden_linear + 1) * HID + n_out)
    weight_bytes = 4 * sum(int(w.size) for w in (wih0, whh0, bih0, bhh0, wihr, whhr,
                                                 bihr, bhhr, w1h, w1y, b1, wh, bh, wo, bo))
    bytes_accessed = 4 * (int(h.size) + int(y2.size) + L * b_pad * H + b_pad * n_out) + weight_bytes
    cost = pl.CostEstimate(flops=int(flops), transcendentals=int(transcendentals),
                           bytes_accessed=int(bytes_accessed))

    kernel = functools.partial(
        _betanet_kernel,
        gru_layers=L, gru_hidden=H, seq_len=T, n_in=n_in,
        n_hidden_linear=n_hidden_linear,
    )

    grid_spec = pltpu.PrefetchScalarGridSpec(
        num_scalar_prefetch=0,
        grid=grid,
        in_specs=in_specs,
        out_specs=out_specs,
    )

    h_out, beta = pl.pallas_call(
        kernel,
        grid_spec=grid_spec,
        out_shape=out_shape,
        compiler_params=pltpu.CompilerParams(
            dimension_semantics=("parallel",),
            vmem_limit_bytes=32 * 1024 * 1024,
        ),
        cost_estimate=cost,
    )(h, y2, wih0, whh0, bih0, bhh0, wihr, whhr, bihr, bhhr,
      w1h, w1y, b1, wh, bh, wo, bo)

    return h_out[:, :B, :], beta[:B, :]


def init_params(key, *, n_in, n_out, gru_hidden, gru_layers,
                linear_hidden, linear_layers, seq_len):
    """PyTorch-style U(-1/sqrt(fan), 1/sqrt(fan)) init. Weights stored (in, out)."""
    assert gru_layers >= 2 and linear_layers >= 2  # TODO(synk): size-0 stacked weights unsupported
    H, L, HID = gru_hidden, gru_layers, linear_hidden
    n_in_mlp = L * H + seq_len * n_in
    keys = iter(jax.random.split(key, 16))

    def u(shape, fan):
        bound = float(fan) ** -0.5
        return jax.random.uniform(next(keys), shape, jnp.float32, -bound, bound)

    wih0 = u((n_in, 3 * H), H)
    whh0 = u((H, 3 * H), H)
    bih0 = u((1, 3 * H), H)
    bhh0 = u((1, 3 * H), H)
    wihr = u((L - 1, H, 3 * H), H)
    whhr = u((L - 1, H, 3 * H), H)
    bihr = u((L - 1, 1, 3 * H), H)
    bhhr = u((L - 1, 1, 3 * H), H)
    w1h = u((L, H, HID), n_in_mlp)            # gru_to_hidden weight, h-chunk, split per GRU layer
    w1y = u((seq_len * n_in, HID), n_in_mlp)  # gru_to_hidden weight, Y-chunk
    b1 = u((1, HID), n_in_mlp)
    wh = u((linear_layers - 1, HID, HID), HID)
    bh = u((linear_layers - 1, 1, HID), HID)
    wo = u((HID, n_out), HID)
    bo = u((1, n_out), HID)
    return (wih0, whh0, bih0, bhh0, wihr, whhr, bihr, bhhr,
            w1h, w1y, b1, wh, bh, wo, bo)


def _reference_forward(h, Y, params):
    """Pure-JAX reference matching the PyTorch betaNet.forward."""
    (wih0, whh0, bih0, bhh0, wihr, whhr, bihr, bhhr,
     w1h, w1y, b1, wh, bh, wo, bo) = params
    L, B, H = h.shape
    _, T, n_in = Y.shape

    layer_in = [Y[:, t, :] for t in range(T)]
    h_out = []
    for l in range(L):
        w_ih = wih0 if l == 0 else wihr[l - 1]
        w_hh = whh0 if l == 0 else whhr[l - 1]
        b_ih = bih0 if l == 0 else bihr[l - 1]
        b_hh = bhh0 if l == 0 else bhhr[l - 1]
        hs = h[l]
        outs = []
        for t in range(T):
            gi = layer_in[t] @ w_ih + b_ih
            gh = hs @ w_hh + b_hh
            r = jax.nn.sigmoid(gi[:, :H] + gh[:, :H])
            z = jax.nn.sigmoid(gi[:, H:2 * H] + gh[:, H:2 * H])
            n = jnp.tanh(gi[:, 2 * H:] + r * gh[:, 2 * H:])
            hs = (1.0 - z) * n + z * hs
            outs.append(hs)
        h_out.append(hs)
        layer_in = outs
    h_out = jnp.stack(h_out, axis=0)

    h_flat = jnp.transpose(h, (1, 0, 2)).reshape(B, L * H)
    y_flat = Y.reshape(B, T * n_in)
    x = jnp.concatenate([h_flat, y_flat], axis=-1)
    w1 = jnp.concatenate([w1h.reshape(L * H, -1), w1y], axis=0)
    x = jax.nn.silu(x @ w1 + b1[0])
    for l in range(wh.shape[0]):
        x = jax.nn.silu(x @ wh[l] + bh[l, 0])
    beta = jax.nn.softmax(x @ wo + bo[0], axis=1)
    return h_out, beta


if __name__ == "__main__":
    key = jax.random.PRNGKey(0)
    k_h, k_y, k_p = jax.random.split(key, 3)

    # Small config consistent with the module: gru_to_hidden expects
    # gru_hidden*gru_layers + 2 + nOut inputs  =>  seq_len * nIn == 2 + nOut.
    n_in, n_out = 2, 4
    gru_hidden, gru_layers = 5, 5
    linear_hidden, linear_layers = 36, 5
    seq_len = (2 + n_out) // n_in            # 3
    assert seq_len * n_in == 2 + n_out
    B = 20                                    # not a multiple of the tile -> exercises padding

    h = jax.random.normal(k_h, (gru_layers, B, gru_hidden), dtype=jnp.float32)
    Y = jax.random.normal(k_y, (B, seq_len, n_in), dtype=jnp.float32)
    params = init_params(k_p, n_in=n_in, n_out=n_out, gru_hidden=gru_hidden,
                         gru_layers=gru_layers, linear_hidden=linear_hidden,
                         linear_layers=linear_layers, seq_len=seq_len)

    # small tile to exercise a multi-step batch grid (grid = 3, last tile padded)
    h_out, beta = betanet_forward(h, Y, params, tile_b=8)
    (h_out, beta) = jax.block_until_ready((h_out, beta))

    h_ref, beta_ref = _reference_forward(h, Y, params)
    assert h_out.shape == (gru_layers, B, gru_hidden), h_out.shape
    assert beta.shape == (B, n_out), beta.shape
    assert jnp.allclose(h_out, h_ref, atol=1e-3, rtol=1e-3)
    assert jnp.allclose(beta, beta_ref, atol=1e-3, rtol=1e-3)
    assert jnp.allclose(jnp.sum(beta, axis=1), 1.0, atol=1e-5)

    print("KERNEL_OK")
</pallas_src>

<mosaic_0001>
module attributes {stable_mosaic.version = 11 : i64} {
  func.func @_betanet_kernel(%arg0: i32, %arg1: memref<5x8x5xf32, #tpu.memory_space<vmem>>, %arg2: memref<8x6xf32, #tpu.memory_space<vmem>>, %arg3: memref<2x15xf32, #tpu.memory_space<vmem>>, %arg4: memref<5x15xf32, #tpu.memory_space<vmem>>, %arg5: memref<1x15xf32, #tpu.memory_space<vmem>>, %arg6: memref<1x15xf32, #tpu.memory_space<vmem>>, %arg7: memref<4x5x15xf32, #tpu.memory_space<vmem>>, %arg8: memref<4x5x15xf32, #tpu.memory_space<vmem>>, %arg9: memref<4x1x15xf32, #tpu.memory_space<vmem>>, %arg10: memref<4x1x15xf32, #tpu.memory_space<vmem>>, %arg11: memref<5x5x36xf32, #tpu.memory_space<vmem>>, %arg12: memref<6x36xf32, #tpu.memory_space<vmem>>, %arg13: memref<1x36xf32, #tpu.memory_space<vmem>>, %arg14: memref<4x36x36xf32, #tpu.memory_space<vmem>>, %arg15: memref<4x1x36xf32, #tpu.memory_space<vmem>>, %arg16: memref<36x4xf32, #tpu.memory_space<vmem>>, %arg17: memref<1x4xf32, #tpu.memory_space<vmem>>, %arg18: memref<5x8x5xf32, #tpu.memory_space<vmem>>, %arg19: memref<8x4xf32, #tpu.memory_space<vmem>>) attributes {dimension_semantics = [#tpu.dimension_semantics<parallel>], iteration_bounds = array<i64: 3>, scalar_prefetch = 0 : i64, scratch_operands = 0 : i64, tpu.core_type = #tpu.core_type<tc>, window_params = [{transform_indices = @transform_0, window_bounds = array<i64: 5, 8, 5>}, {transform_indices = @transform_1, window_bounds = array<i64: 8, 6>}, {pipeline_mode = #tpu.pipeline_mode<synchronous>, transform_indices = @transform_2, window_bounds = array<i64: 2, 15>}, {pipeline_mode = #tpu.pipeline_mode<synchronous>, transform_indices = @transform_3, window_bounds = array<i64: 5, 15>}, {pipeline_mode = #tpu.pipeline_mode<synchronous>, transform_indices = @transform_4, window_bounds = array<i64: 1, 15>}, {pipeline_mode = #tpu.pipeline_mode<synchronous>, transform_indices = @transform_5, window_bounds = array<i64: 1, 15>}, {pipeline_mode = #tpu.pipeline_mode<synchronous>, transform_indices = @transform_6, window_bounds = array<i64: 4, 5, 15>}, {pipeline_mode = #tpu.pipeline_mode<synchronous>, transform_indices = @transform_7, window_bounds = array<i64: 4, 5, 15>}, {pipeline_mode = #tpu.pipeline_mode<synchronous>, transform_indices = @transform_8, window_bounds = array<i64: 4, 1, 15>}, {pipeline_mode = #tpu.pipeline_mode<synchronous>, transform_indices = @transform_9, window_bounds = array<i64: 4, 1, 15>}, {pipeline_mode = #tpu.pipeline_mode<synchronous>, transform_indices = @transform_10, window_bounds = array<i64: 5, 5, 36>}, {pipeline_mode = #tpu.pipeline_mode<synchronous>, transform_indices = @transform_11, window_bounds = array<i64: 6, 36>}, {pipeline_mode = #tpu.pipeline_mode<synchronous>, transform_indices = @transform_12, window_bounds = array<i64: 1, 36>}, {pipeline_mode = #tpu.pipeline_mode<synchronous>, transform_indices = @transform_13, window_bounds = array<i64: 4, 36, 36>}, {pipeline_mode = #tpu.pipeline_mode<synchronous>, transform_indices = @transform_14, window_bounds = array<i64: 4, 1, 36>}, {pipeline_mode = #tpu.pipeline_mode<synchronous>, transform_indices = @transform_15, window_bounds = array<i64: 36, 4>}, {pipeline_mode = #tpu.pipeline_mode<synchronous>, transform_indices = @transform_16, window_bounds = array<i64: 1, 4>}, {transform_indices = @transform_17, window_bounds = array<i64: 5, 8, 5>}, {transform_indices = @transform_18, window_bounds = array<i64: 8, 4>}]} {
    %c0 = arith.constant 0 : index
    %c0_0 = arith.constant 0 : index
    %0 = vector.load %arg2[%c0, %c0_0] : memref<8x6xf32, #tpu.memory_space<vmem>>, vector<8x6xf32>
    %1 = vector.extract_strided_slice %0 {offsets = [0, 0], sizes = [8, 2], strides = [1, 1]} : vector<8x6xf32> to vector<8x2xf32>
    %2 = vector.extract_strided_slice %0 {offsets = [0, 2], sizes = [8, 2], strides = [1, 1]} : vector<8x6xf32> to vector<8x2xf32>
    %3 = vector.extract_strided_slice %0 {offsets = [0, 4], sizes = [8, 2], strides = [1, 1]} : vector<8x6xf32> to vector<8x2xf32>
    %c0_1 = arith.constant 0 : index
    %c0_2 = arith.constant 0 : index
    %4 = vector.load %arg3[%c0_1, %c0_2] : memref<2x15xf32, #tpu.memory_space<vmem>>, vector<2x15xf32>
    %c0_3 = arith.constant 0 : index
    %c0_4 = arith.constant 0 : index
    %5 = vector.load %arg4[%c0_3, %c0_4] : memref<5x15xf32, #tpu.memory_space<vmem>>, vector<5x15xf32>
    %c0_5 = arith.constant 0 : index
    %c0_6 = arith.constant 0 : index
    %6 = vector.load %arg5[%c0_5, %c0_6] : memref<1x15xf32, #tpu.memory_space<vmem>>, vector<1x15xf32>
    %c0_7 = arith.constant 0 : index
    %c0_8 = arith.constant 0 : index
    %7 = vector.load %arg6[%c0_7, %c0_8] : memref<1x15xf32, #tpu.memory_space<vmem>>, vector<1x15xf32>
    %c0_9 = arith.constant 0 : index
    %c0_10 = arith.constant 0 : index
    %c0_11 = arith.constant 0 : index
    %8 = vector.load %arg1[%c0_9, %c0_10, %c0_11] : memref<5x8x5xf32, #tpu.memory_space<vmem>>, vector<1x8x5xf32>
    %9 = vector.shape_cast %8 : vector<1x8x5xf32> to vector<8x5xf32>
    %cst = arith.constant dense<0.000000e+00> : vector<8x15xf32>
    %10 = tpu.matmul %1, %4, %cst {dimension_numbers = #tpu.dot_dimension_numbers<[1], [0], [0], [1], [0, 0, 1, 1], [], []>} : vector<8x2xf32>, vector<2x15xf32>, vector<8x15xf32> -> vector<8x15xf32>
    %11 = vector.broadcast %6 : vector<1x15xf32> to vector<8x15xf32>
    %12 = arith.addf %10, %11 : vector<8x15xf32>
    %cst_12 = arith.constant dense<0.000000e+00> : vector<8x15xf32>
    %13 = tpu.matmul %9, %5, %cst_12 {dimension_numbers = #tpu.dot_dimension_numbers<[1], [0], [0], [1], [0, 0, 1, 1], [], []>} : vector<8x5xf32>, vector<5x15xf32>, vector<8x15xf32> -> vector<8x15xf32>
    %14 = vector.broadcast %7 : vector<1x15xf32> to vector<8x15xf32>
    %15 = arith.addf %13, %14 : vector<8x15xf32>
    %16 = vector.extract_strided_slice %12 {offsets = [0, 0], sizes = [8, 5], strides = [1, 1]} : vector<8x15xf32> to vector<8x5xf32>
    %17 = vector.extract_strided_slice %15 {offsets = [0, 0], sizes = [8, 5], strides = [1, 1]} : vector<8x15xf32> to vector<8x5xf32>
    %18 = arith.addf %16, %17 : vector<8x5xf32>
    %19 = arith.negf %18 : vector<8x5xf32>
    %20 = math.exp %19 : vector<8x5xf32>
    %cst_13 = arith.constant 1.000000e+00 : f32
    %21 = vector.broadcast %cst_13 : f32 to vector<8x5xf32>
    %22 = arith.addf %21, %20 : vector<8x5xf32>
    %23 = arith.divf %21, %22 : vector<8x5xf32>
    %24 = vector.extract_strided_slice %12 {offsets = [0, 5], sizes = [8, 5], strides = [1, 1]} : vector<8x15xf32> to vector<8x5xf32>
    %25 = vector.extract_strided_slice %15 {offsets = [0, 5], sizes = [8, 5], strides = [1, 1]} : vector<8x15xf32> to vector<8x5xf32>
    %26 = arith.addf %24, %25 : vector<8x5xf32>
    %27 = arith.negf %26 : vector<8x5xf32>
    %28 = math.exp %27 : vector<8x5xf32>
    %cst_14 = arith.constant 1.000000e+00 : f32
    %29 = vector.broadcast %cst_14 : f32 to vector<8x5xf32>
    %30 = arith.addf %29, %28 : vector<8x5xf32>
    %31 = arith.divf %29, %30 : vector<8x5xf32>
    %32 = vector.extract_strided_slice %12 {offsets = [0, 10], sizes = [8, 5], strides = [1, 1]} : vector<8x15xf32> to vector<8x5xf32>
    %33 = vector.extract_strided_slice %15 {offsets = [0, 10], sizes = [8, 5], strides = [1, 1]} : vector<8x15xf32> to vector<8x5xf32>
    %34 = arith.mulf %23, %33 : vector<8x5xf32>
    %35 = arith.addf %32, %34 : vector<8x5xf32>
    %36 = math.tanh %35 : vector<8x5xf32>
    %cst_15 = arith.constant 1.000000e+00 : f32
    %37 = vector.broadcast %cst_15 : f32 to vector<8x5xf32>
    %38 = arith.subf %37, %31 : vector<8x5xf32>
    %39 = arith.mulf %38, %36 : vector<8x5xf32>
    %40 = arith.mulf %31, %9 : vector<8x5xf32>
    %41 = arith.addf %39, %40 : vector<8x5xf32>
    %cst_16 = arith.constant dense<0.000000e+00> : vector<8x15xf32>
    %42 = tpu.matmul %2, %4, %cst_16 {dimension_numbers = #tpu.dot_dimension_numbers<[1], [0], [0], [1], [0, 0, 1, 1], [], []>} : vector<8x2xf32>, vector<2x15xf32>, vector<8x15xf32> -> vector<8x15xf32>
    %43 = vector.broadcast %6 : vector<1x15xf32> to vector<8x15xf32>
    %44 = arith.addf %42, %43 : vector<8x15xf32>
    %cst_17 = arith.constant dense<0.000000e+00> : vector<8x15xf32>
    %45 = tpu.matmul %41, %5, %cst_17 {dimension_numbers = #tpu.dot_dimension_numbers<[1], [0], [0], [1], [0, 0, 1, 1], [], []>} : vector<8x5xf32>, vector<5x15xf32>, vector<8x15xf32> -> vector<8x15xf32>
    %46 = vector.broadcast %7 : vector<1x15xf32> to vector<8x15xf32>
    %47 = arith.addf %45, %46 : vector<8x15xf32>
    %48 = vector.extract_strided_slice %44 {offsets = [0, 0], sizes = [8, 5], strides = [1, 1]} : vector<8x15xf32> to vector<8x5xf32>
    %49 = vector.extract_strided_slice %47 {offsets = [0, 0], sizes = [8, 5], strides = [1, 1]} : vector<8x15xf32> to vector<8x5xf32>
    %50 = arith.addf %48, %49 : vector<8x5xf32>
    %51 = arith.negf %50 : vector<8x5xf32>
    %52 = math.exp %51 : vector<8x5xf32>
    %cst_18 = arith.constant 1.000000e+00 : f32
    %53 = vector.broadcast %cst_18 : f32 to vector<8x5xf32>
    %54 = arith.addf %53, %52 : vector<8x5xf32>
    %55 = arith.divf %53, %54 : vector<8x5xf32>
    %56 = vector.extract_strided_slice %44 {offsets = [0, 5], sizes = [8, 5], strides = [1, 1]} : vector<8x15xf32> to vector<8x5xf32>
    %57 = vector.extract_strided_slice %47 {offsets = [0, 5], sizes = [8, 5], strides = [1, 1]} : vector<8x15xf32> to vector<8x5xf32>
    %58 = arith.addf %56, %57 : vector<8x5xf32>
    %59 = arith.negf %58 : vector<8x5xf32>
    %60 = math.exp %59 : vector<8x5xf32>
    %cst_19 = arith.constant 1.000000e+00 : f32
    %61 = vector.broadcast %cst_19 : f32 to vector<8x5xf32>
    %62 = arith.addf %61, %60 : vector<8x5xf32>
    %63 = arith.divf %61, %62 : vector<8x5xf32>
    %64 = vector.extract_strided_slice %44 {offsets = [0, 10], sizes = [8, 5], strides = [1, 1]} : vector<8x15xf32> to vector<8x5xf32>
    %65 = vector.extract_strided_slice %47 {offsets = [0, 10], sizes = [8, 5], strides = [1, 1]} : vector<8x15xf32> to vector<8x5xf32>
    %66 = arith.mulf %55, %65 : vector<8x5xf32>
    %67 = arith.addf %64, %66 : vector<8x5xf32>
    %68 = math.tanh %67 : vector<8x5xf32>
    %cst_20 = arith.constant 1.000000e+00 : f32
    %69 = vector.broadcast %cst_20 : f32 to vector<8x5xf32>
    %70 = arith.subf %69, %63 : vector<8x5xf32>
    %71 = arith.mulf %70, %68 : vector<8x5xf32>
    %72 = arith.mulf %63, %41 : vector<8x5xf32>
    %73 = arith.addf %71, %72 : vector<8x5xf32>
    %cst_21 = arith.constant dense<0.000000e+00> : vector<8x15xf32>
    %74 = tpu.matmul %3, %4, %cst_21 {dimension_numbers = #tpu.dot_dimension_numbers<[1], [0], [0], [1], [0, 0, 1, 1], [], []>} : vector<8x2xf32>, vector<2x15xf32>, vector<8x15xf32> -> vector<8x15xf32>
    %75 = vector.broadcast %6 : vector<1x15xf32> to vector<8x15xf32>
    %76 = arith.addf %74, %75 : vector<8x15xf32>
    %cst_22 = arith.constant dense<0.000000e+00> : vector<8x15xf32>
    %77 = tpu.matmul %73, %5, %cst_22 {dimension_numbers = #tpu.dot_dimension_numbers<[1], [0], [0], [1], [0, 0, 1, 1], [], []>} : vector<8x5xf32>, vector<5x15xf32>, vector<8x15xf32> -> vector<8x15xf32>
    %78 = vector.broadcast %7 : vector<1x15xf32> to vector<8x15xf32>
    %79 = arith.addf %77, %78 : vector<8x15xf32>
    %80 = vector.extract_strided_slice %76 {offsets = [0, 0], sizes = [8, 5], strides = [1, 1]} : vector<8x15xf32> to vector<8x5xf32>
    %81 = vector.extract_strided_slice %79 {offsets = [0, 0], sizes = [8, 5], strides = [1, 1]} : vector<8x15xf32> to vector<8x5xf32>
    %82 = arith.addf %80, %81 : vector<8x5xf32>
    %83 = arith.negf %82 : vector<8x5xf32>
    %84 = math.exp %83 : vector<8x5xf32>
    %cst_23 = arith.constant 1.000000e+00 : f32
    %85 = vector.broadcast %cst_23 : f32 to vector<8x5xf32>
    %86 = arith.addf %85, %84 : vector<8x5xf32>
    %87 = arith.divf %85, %86 : vector<8x5xf32>
    %88 = vector.extract_strided_slice %76 {offsets = [0, 5], sizes = [8, 5], strides = [1, 1]} : vector<8x15xf32> to vector<8x5xf32>
    %89 = vector.extract_strided_slice %79 {offsets = [0, 5], sizes = [8, 5], strides = [1, 1]} : vector<8x15xf32> to vector<8x5xf32>
    %90 = arith.addf %88, %89 : vector<8x5xf32>
    %91 = arith.negf %90 : vector<8x5xf32>
    %92 = math.exp %91 : vector<8x5xf32>
    %cst_24 = arith.constant 1.000000e+00 : f32
    %93 = vector.broadcast %cst_24 : f32 to vector<8x5xf32>
    %94 = arith.addf %93, %92 : vector<8x5xf32>
    %95 = arith.divf %93, %94 : vector<8x5xf32>
    %96 = vector.extract_strided_slice %76 {offsets = [0, 10], sizes = [8, 5], strides = [1, 1]} : vector<8x15xf32> to vector<8x5xf32>
    %97 = vector.extract_strided_slice %79 {offsets = [0, 10], sizes = [8, 5], strides = [1, 1]} : vector<8x15xf32> to vector<8x5xf32>
    %98 = arith.mulf %87, %97 : vector<8x5xf32>
    %99 = arith.addf %96, %98 : vector<8x5xf32>
    %100 = math.tanh %99 : vector<8x5xf32>
    %cst_25 = arith.constant 1.000000e+00 : f32
    %101 = vector.broadcast %cst_25 : f32 to vector<8x5xf32>
    %102 = arith.subf %101, %95 : vector<8x5xf32>
    %103 = arith.mulf %102, %100 : vector<8x5xf32>
    %104 = arith.mulf %95, %73 : vector<8x5xf32>
    %105 = arith.addf %103, %104 : vector<8x5xf32>
    %c0_26 = arith.constant 0 : index
    %c0_27 = arith.constant 0 : index
    %c0_28 = arith.constant 0 : index
    %106 = vector.load %arg18[%c0_26, %c0_27, %c0_28] : memref<5x8x5xf32, #tpu.memory_space<vmem>>, vector<1x8x5xf32>
    %107 = vector.shape_cast %106 : vector<1x8x5xf32> to vector<8x5xf32>
    %108 = vector.shape_cast %105 : vector<8x5xf32> to vector<1x8x5xf32>
    tpu.vector_store %arg18[%c0_26, %c0_27, %c0_28], %108 {strides = array<i32>} : memref<5x8x5xf32, #tpu.memory_space<vmem>>, vector<1x8x5xf32>,
    %c0_29 = arith.constant 0 : index
    %c0_30 = arith.constant 0 : index
    %c0_31 = arith.constant 0 : index
    %109 = vector.load %arg7[%c0_29, %c0_30, %c0_31] : memref<4x5x15xf32, #tpu.memory_space<vmem>>, vector<1x5x15xf32>
    %110 = vector.shape_cast %109 : vector<1x5x15xf32> to vector<5x15xf32>
    %c0_32 = arith.constant 0 : index
    %c0_33 = arith.constant 0 : index
    %c0_34 = arith.constant 0 : index
    %111 = vector.load %arg8[%c0_32, %c0_33, %c0_34] : memref<4x5x15xf32, #tpu.memory_space<vmem>>, vector<1x5x15xf32>
    %112 = vector.shape_cast %111 : vector<1x5x15xf32> to vector<5x15xf32>
    %c0_35 = arith.constant 0 : index
    %c0_36 = arith.constant 0 : index
    %c0_37 = arith.constant 0 : index
    %113 = vector.load %arg9[%c0_35, %c0_36, %c0_37] : memref<4x1x15xf32, #tpu.memory_space<vmem>>, vector<1x1x15xf32>
    %114 = vector.shape_cast %113 : vector<1x1x15xf32> to vector<1x15xf32>
    %c0_38 = arith.constant 0 : index
    %c0_39 = arith.constant 0 : index
    %c0_40 = arith.constant 0 : index
    %115 = vector.load %arg10[%c0_38, %c0_39, %c0_40] : memref<4x1x15xf32, #tpu.memory_space<vmem>>, vector<1x1x15xf32>
    %116 = vector.shape_cast %115 : vector<1x1x15xf32> to vector<1x15xf32>
    %c1 = arith.constant 1 : index
    %c0_41 = arith.constant 0 : index
    %c0_42 = arith.constant 0 : index
    %117 = vector.load %arg1[%c1, %c0_41, %c0_42] : memref<5x8x5xf32, #tpu.memory_space<vmem>>, vector<1x8x5xf32>
    %118 = vector.shape_cast %117 : vector<1x8x5xf32> to vector<8x5xf32>
    %cst_43 = arith.constant dense<0.000000e+00> : vector<8x15xf32>
    %119 = tpu.matmul %41, %110, %cst_43 {dimension_numbers = #tpu.dot_dimension_numbers<[1], [0], [0], [1], [0, 0, 1, 1], [], []>} : vector<8x5xf32>, vector<5x15xf32>, vector<8x15xf32> -> vector<8x15xf32>
    %120 = vector.broadcast %114 : vector<1x15xf32> to vector<8x15xf32>
    %121 = arith.addf %119, %120 : vector<8x15xf32>
    %cst_44 = arith.constant dense<0.000000e+00> : vector<8x15xf32>
    %122 = tpu.matmul %118, %112, %cst_44 {dimension_numbers = #tpu.dot_dimension_numbers<[1], [0], [0], [1], [0, 0, 1, 1], [], []>} : vector<8x5xf32>, vector<5x15xf32>, vector<8x15xf32> -> vector<8x15xf32>
    %123 = vector.broadcast %116 : vector<1x15xf32> to vector<8x15xf32>
    %124 = arith.addf %122, %123 : vector<8x15xf32>
    %125 = vector.extract_strided_slice %121 {offsets = [0, 0], sizes = [8, 5], strides = [1, 1]} : vector<8x15xf32> to vector<8x5xf32>
    %126 = vector.extract_strided_slice %124 {offsets = [0, 0], sizes = [8, 5], strides = [1, 1]} : vector<8x15xf32> to vector<8x5xf32>
    %127 = arith.addf %125, %126 : vector<8x5xf32>
    %128 = arith.negf %127 : vector<8x5xf32>
    %129 = math.exp %128 : vector<8x5xf32>
    %cst_45 = arith.constant 1.000000e+00 : f32
    %130 = vector.broadcast %cst_45 : f32 to vector<8x5xf32>
    %131 = arith.addf %130, %129 : vector<8x5xf32>
    %132 = arith.divf %130, %131 : vector<8x5xf32>
    %133 = vector.extract_strided_slice %121 {offsets = [0, 5], sizes = [8, 5], strides = [1, 1]} : vector<8x15xf32> to vector<8x5xf32>
    %134 = vector.extract_strided_slice %124 {offsets = [0, 5], sizes = [8, 5], strides = [1, 1]} : vector<8x15xf32> to vector<8x5xf32>
    %135 = arith.addf %133, %134 : vector<8x5xf32>
    %136 = arith.negf %135 : vector<8x5xf32>
    %137 = math.exp %136 : vector<8x5xf32>
    %cst_46 = arith.constant 1.000000e+00 : f32
    %138 = vector.broadcast %cst_46 : f32 to vector<8x5xf32>
    %139 = arith.addf %138, %137 : vector<8x5xf32>
    %140 = arith.divf %138, %139 : vector<8x5xf32>
    %141 = vector.extract_strided_slice %121 {offsets = [0, 10], sizes = [8, 5], strides = [1, 1]} : vector<8x15xf32> to vector<8x5xf32>
    %142 = vector.extract_strided_slice %124 {offsets = [0, 10], sizes = [8, 5], strides = [1, 1]} : vector<8x15xf32> to vector<8x5xf32>
    %143 = arith.mulf %132, %142 : vector<8x5xf32>
    %144 = arith.addf %141, %143 : vector<8x5xf32>
    %145 = math.tanh %144 : vector<8x5xf32>
    %cst_47 = arith.constant 1.000000e+00 : f32
    %146 = vector.broadcast %cst_47 : f32 to vector<8x5xf32>
    %147 = arith.subf %146, %140 : vector<8x5xf32>
    %148 = arith.mulf %147, %145 : vector<8x5xf32>
    %149 = arith.mulf %140, %118 : vector<8x5xf32>
    %150 = arith.addf %148, %149 : vector<8x5xf32>
    %cst_48 = arith.constant dense<0.000000e+00> : vector<8x15xf32>
    %151 = tpu.matmul %73, %110, %cst_48 {dimension_numbers = #tpu.dot_dimension_numbers<[1], [0], [0], [1], [0, 0, 1, 1], [], []>} : vector<8x5xf32>, vector<5x15xf32>, vector<8x15xf32> -> vector<8x15xf32>
    %152 = vector.broadcast %114 : vector<1x15xf32> to vector<8x15xf32>
    %153 = arith.addf %151, %152 : vector<8x15xf32>
    %cst_49 = arith.constant dense<0.000000e+00> : vector<8x15xf32>
    %154 = tpu.matmul %150, %112, %cst_49 {dimension_numbers = #tpu.dot_dimension_numbers<[1], [0], [0], [1], [0, 0, 1, 1], [], []>} : vector<8x5xf32>, vector<5x15xf32>, vector<8x15xf32> -> vector<8x15xf32>
    %155 = vector.broadcast %116 : vector<1x15xf32> to vector<8x15xf32>
    %156 = arith.addf %154, %155 : vector<8x15xf32>
    %157 = vector.extract_strided_slice %153 {offsets = [0, 0], sizes = [8, 5], strides = [1, 1]} : vector<8x15xf32> to vector<8x5xf32>
    %158 = vector.extract_strided_slice %156 {offsets = [0, 0], sizes = [8, 5], strides = [1, 1]} : vector<8x15xf32> to vector<8x5xf32>
    %159 = arith.addf %157, %158 : vector<8x5xf32>
    %160 = arith.negf %159 : vector<8x5xf32>
    %161 = math.exp %160 : vector<8x5xf32>
    %cst_50 = arith.constant 1.000000e+00 : f32
    %162 = vector.broadcast %cst_50 : f32 to vector<8x5xf32>
    %163 = arith.addf %162, %161 : vector<8x5xf32>
    %164 = arith.divf %162, %163 : vector<8x5xf32>
    %165 = vector.extract_strided_slice %153 {offsets = [0, 5], sizes = [8, 5], strides = [1, 1]} : vector<8x15xf32> to vector<8x5xf32>
    %166 = vector.extract_strided_slice %156 {offsets = [0, 5], sizes = [8, 5], strides = [1, 1]} : vector<8x15xf32> to vector<8x5xf32>
    %167 = arith.addf %165, %166 : vector<8x5xf32>
    %168 = arith.negf %167 : vector<8x5xf32>
    %169 = math.exp %168 : vector<8x5xf32>
    %cst_51 = arith.constant 1.000000e+00 : f32
    %170 = vector.broadcast %cst_51 : f32 to vector<8x5xf32>
    %171 = arith.addf %170, %169 : vector<8x5xf32>
    %172 = arith.divf %170, %171 : vector<8x5xf32>
    %173 = vector.extract_strided_slice %153 {offsets = [0, 10], sizes = [8, 5], strides = [1, 1]} : vector<8x15xf32> to vector<8x5xf32>
    %174 = vector.extract_strided_slice %156 {offsets = [0, 10], sizes = [8, 5], strides = [1, 1]} : vector<8x15xf32> to vector<8x5xf32>
    %175 = arith.mulf %164, %174 : vector<8x5xf32>
    %176 = arith.addf %173, %175 : vector<8x5xf32>
    %177 = math.tanh %176 : vector<8x5xf32>
    %cst_52 = arith.constant 1.000000e+00 : f32
    %178 = vector.broadcast %cst_52 : f32 to vector<8x5xf32>
    %179 = arith.subf %178, %172 : vector<8x5xf32>
    %180 = arith.mulf %179, %177 : vector<8x5xf32>
    %181 = arith.mulf %172, %150 : vector<8x5xf32>
    %182 = arith.addf %180, %181 : vector<8x5xf32>
    %cst_53 = arith.constant dense<0.000000e+00> : vector<8x15xf32>
    %183 = tpu.matmul %105, %110, %cst_53 {dimension_numbers = #tpu.dot_dimension_numbers<[1], [0], [0], [1], [0, 0, 1, 1], [], []>} : vector<8x5xf32>, vector<5x15xf32>, vector<8x15xf32> -> vector<8x15xf32>
    %184 = vector.broadcast %114 : vector<1x15xf32> to vector<8x15xf32>
    %185 = arith.addf %183, %184 : vector<8x15xf32>
    %cst_54 = arith.constant dense<0.000000e+00> : vector<8x15xf32>
    %186 = tpu.matmul %182, %112, %cst_54 {dimension_numbers = #tpu.dot_dimension_numbers<[1], [0], [0], [1], [0, 0, 1, 1], [], []>} : vector<8x5xf32>, vector<5x15xf32>, vector<8x15xf32> -> vector<8x15xf32>
    %187 = vector.broadcast %116 : vector<1x15xf32> to vector<8x15xf32>
    %188 = arith.addf %186, %187 : vector<8x15xf32>
    %189 = vector.extract_strided_slice %185 {offsets = [0, 0], sizes = [8, 5], strides = [1, 1]} : vector<8x15xf32> to vector<8x5xf32>
    %190 = vector.extract_strided_slice %188 {offsets = [0, 0], sizes = [8, 5], strides = [1, 1]} : vector<8x15xf32> to vector<8x5xf32>
    %191 = arith.addf %189, %190 : vector<8x5xf32>
    %192 = arith.negf %191 : vector<8x5xf32>
    %193 = math.exp %192 : vector<8x5xf32>
    %cst_55 = arith.constant 1.000000e+00 : f32
    %194 = vector.broadcast %cst_55 : f32 to vector<8x5xf32>
    %195 = arith.addf %194, %193 : vector<8x5xf32>
    %196 = arith.divf %194, %195 : vector<8x5xf32>
    %197 = vector.extract_strided_slice %185 {offsets = [0, 5], sizes = [8, 5], strides = [1, 1]} : vector<8x15xf32> to vector<8x5xf32>
    %198 = vector.extract_strided_slice %188 {offsets = [0, 5], sizes = [8, 5], strides = [1, 1]} : vector<8x15xf32> to vector<8x5xf32>
    %199 = arith.addf %197, %198 : vector<8x5xf32>
    %200 = arith.negf %199 : vector<8x5xf32>
    %201 = math.exp %200 : vector<8x5xf32>
    %cst_56 = arith.constant 1.000000e+00 : f32
    %202 = vector.broadcast %cst_56 : f32 to vector<8x5xf32>
    %203 = arith.addf %202, %201 : vector<8x5xf32>
    %204 = arith.divf %202, %203 : vector<8x5xf32>
    %205 = vector.extract_strided_slice %185 {offsets = [0, 10], sizes = [8, 5], strides = [1, 1]} : vector<8x15xf32> to vector<8x5xf32>
    %206 = vector.extract_strided_slice %188 {offsets = [0, 10], sizes = [8, 5], strides = [1, 1]} : vector<8x15xf32> to vector<8x5xf32>
    %207 = arith.mulf %196, %206 : vector<8x5xf32>
    %208 = arith.addf %205, %207 : vector<8x5xf32>
    %209 = math.tanh %208 : vector<8x5xf32>
    %cst_57 = arith.constant 1.000000e+00 : f32
    %210 = vector.broadcast %cst_57 : f32 to vector<8x5xf32>
    %211 = arith.subf %210, %204 : vector<8x5xf32>
    %212 = arith.mulf %211, %209 : vector<8x5xf32>
    %213 = arith.mulf %204, %182 : vector<8x5xf32>
    %214 = arith.addf %212, %213 : vector<8x5xf32>
    %c1_58 = arith.constant 1 : index
    %c0_59 = arith.constant 0 : index
    %c0_60 = arith.constant 0 : index
    %215 = vector.load %arg18[%c1_58, %c0_59, %c0_60] : memref<5x8x5xf32, #tpu.memory_space<vmem>>, vector<1x8x5xf32>
    %216 = vector.shape_cast %215 : vector<1x8x5xf32> to vector<8x5xf32>
    %217 = vector.shape_cast %214 : vector<8x5xf32> to vector<1x8x5xf32>
    tpu.vector_store %arg18[%c1_58, %c0_59, %c0_60], %217 {strides = array<i32>} : memref<5x8x5xf32, #tpu.memory_space<vmem>>, vector<1x8x5xf32>,
    %c1_61 = arith.constant 1 : index
    %c0_62 = arith.constant 0 : index
    %c0_63 = arith.constant 0 : index
    %218 = vector.load %arg7[%c1_61, %c0_62, %c0_63] : memref<4x5x15xf32, #tpu.memory_space<vmem>>, vector<1x5x15xf32>
    %219 = vector.shape_cast %218 : vector<1x5x15xf32> to vector<5x15xf32>
    %c1_64 = arith.constant 1 : index
    %c0_65 = arith.constant 0 : index
    %c0_66 = arith.constant 0 : index
    %220 = vector.load %arg8[%c1_64, %c0_65, %c0_66] : memref<4x5x15xf32, #tpu.memory_space<vmem>>, vector<1x5x15xf32>
    %221 = vector.shape_cast %220 : vector<1x5x15xf32> to vector<5x15xf32>
    %c1_67 = arith.constant 1 : index
    %c0_68 = arith.constant 0 : index
    %c0_69 = arith.constant 0 : index
    %222 = vector.load %arg9[%c1_67, %c0_68, %c0_69] : memref<4x1x15xf32, #tpu.memory_space<vmem>>, vector<1x1x15xf32>
    %223 = vector.shape_cast %222 : vector<1x1x15xf32> to vector<1x15xf32>
    %c1_70 = arith.constant 1 : index
    %c0_71 = arith.constant 0 : index
    %c0_72 = arith.constant 0 : index
    %224 = vector.load %arg10[%c1_70, %c0_71, %c0_72] : memref<4x1x15xf32, #tpu.memory_space<vmem>>, vector<1x1x15xf32>
    %225 = vector.shape_cast %224 : vector<1x1x15xf32> to vector<1x15xf32>
    %c2 = arith.constant 2 : index
    %c0_73 = arith.constant 0 : index
    %c0_74 = arith.constant 0 : index
    %226 = vector.load %arg1[%c2, %c0_73, %c0_74] : memref<5x8x5xf32, #tpu.memory_space<vmem>>, vector<1x8x5xf32>
    %227 = vector.shape_cast %226 : vector<1x8x5xf32> to vector<8x5xf32>
    %cst_75 = arith.constant dense<0.000000e+00> : vector<8x15xf32>
    %228 = tpu.matmul %150, %219, %cst_75 {dimension_numbers = #tpu.dot_dimension_numbers<[1], [0], [0], [1], [0, 0, 1, 1], [], []>} : vector<8x5xf32>, vector<5x15xf32>, vector<8x15xf32> -> vector<8x15xf32>
    %229 = vector.broadcast %223 : vector<1x15xf32> to vector<8x15xf32>
    %230 = arith.addf %228, %229 : vector<8x15xf32>
    %cst_76 = arith.constant dense<0.000000e+00> : vector<8x15xf32>
    %231 = tpu.matmul %227, %221, %cst_76 {dimension_numbers = #tpu.dot_dimension_numbers<[1], [0], [0], [1], [0, 0, 1, 1], [], []>} : vector<8x5xf32>, vector<5x15xf32>, vector<8x15xf32> -> vector<8x15xf32>
    %232 = vector.broadcast %225 : vector<1x15xf32> to vector<8x15xf32>
    %233 = arith.addf %231, %232 : vector<8x15xf32>
    %234 = vector.extract_strided_slice %230 {offsets = [0, 0], sizes = [8, 5], strides = [1, 1]} : vector<8x15xf32> to vector<8x5xf32>
    %235 = vector.extract_strided_slice %233 {offsets = [0, 0], sizes = [8, 5], strides = [1, 1]} : vector<8x15xf32> to vector<8x5xf32>
    %236 = arith.addf %234, %235 : vector<8x5xf32>
    %237 = arith.negf %236 : vector<8x5xf32>
    %238 = math.exp %237 : vector<8x5xf32>
    %cst_77 = arith.constant 1.000000e+00 : f32
    %239 = vector.broadcast %cst_77 : f32 to vector<8x5xf32>
    %240 = arith.addf %239, %238 : vector<8x5xf32>
    %241 = arith.divf %239, %240 : vector<8x5xf32>
    %242 = vector.extract_strided_slice %230 {offsets = [0, 5], sizes = [8, 5], strides = [1, 1]} : vector<8x15xf32> to vector<8x5xf32>
    %243 = vector.extract_strided_slice %233 {offsets = [0, 5], sizes = [8, 5], strides = [1, 1]} : vector<8x15xf32> to vector<8x5xf32>
    %244 = arith.addf %242, %243 : vector<8x5xf32>
    %245 = arith.negf %244 : vector<8x5xf32>
    %246 = math.exp %245 : vector<8x5xf32>
    %cst_78 = arith.constant 1.000000e+00 : f32
    %247 = vector.broadcast %cst_78 : f32 to vector<8x5xf32>
    %248 = arith.addf %247, %246 : vector<8x5xf32>
    %249 = arith.divf %247, %248 : vector<8x5xf32>
    %250 = vector.extract_strided_slice %230 {offsets = [0, 10], sizes = [8, 5], strides = [1, 1]} : vector<8x15xf32> to vector<8x5xf32>
    %251 = vector.extract_strided_slice %233 {offsets = [0, 10], sizes = [8, 5], strides = [1, 1]} : vector<8x15xf32> to vector<8x5xf32>
    %252 = arith.mulf %241, %251 : vector<8x5xf32>
    %253 = arith.addf %250, %252 : vector<8x5xf32>
    %254 = math.tanh %253 : vector<8x5xf32>
    %cst_79 = arith.constant 1.000000e+00 : f32
    %255 = vector.broadcast %cst_79 : f32 to vector<8x5xf32>
    %256 = arith.subf %255, %249 : vector<8x5xf32>
    %257 = arith.mulf %256, %254 : vector<8x5xf32>
    %258 = arith.mulf %249, %227 : vector<8x5xf32>
    %259 = arith.addf %257, %258 : vector<8x5xf32>
    %cst_80 = arith.constant dense<0.000000e+00> : vector<8x15xf32>
    %260 = tpu.matmul %182, %219, %cst_80 {dimension_numbers = #tpu.dot_dimension_numbers<[1], [0], [0], [1], [0, 0, 1, 1], [], []>} : vector<8x5xf32>, vector<5x15xf32>, vector<8x15xf32> -> vector<8x15xf32>
    %261 = vector.broadcast %223 : vector<1x15xf32> to vector<8x15xf32>
    %262 = arith.addf %260, %261 : vector<8x15xf32>
    %cst_81 = arith.constant dense<0.000000e+00> : vector<8x15xf32>
    %263 = tpu.matmul %259, %221, %cst_81 {dimension_numbers = #tpu.dot_dimension_numbers<[1], [0], [0], [1], [0, 0, 1, 1], [], []>} : vector<8x5xf32>, vector<5x15xf32>, vector<8x15xf32> -> vector<8x15xf32>
    %264 = vector.broadcast %225 : vector<1x15xf32> to vector<8x15xf32>
    %265 = arith.addf %263, %264 : vector<8x15xf32>
    %266 = vector.extract_strided_slice %262 {offsets = [0, 0], sizes = [8, 5], strides = [1, 1]} : vector<8x15xf32> to vector<8x5xf32>
    %267 = vector.extract_strided_slice %265 {offsets = [0, 0], sizes = [8, 5], strides = [1, 1]} : vector<8x15xf32> to vector<8x5xf32>
    %268 = arith.addf %266, %267 : vector<8x5xf32>
    %269 = arith.negf %268 : vector<8x5xf32>
    %270 = math.exp %269 : vector<8x5xf32>
    %cst_82 = arith.constant 1.000000e+00 : f32
    %271 = vector.broadcast %cst_82 : f32 to vector<8x5xf32>
    %272 = arith.addf %271, %270 : vector<8x5xf32>
    %273 = arith.divf %271, %272 : vector<8x5xf32>
    %274 = vector.extract_strided_slice %262 {offsets = [0, 5], sizes = [8, 5], strides = [1, 1]} : vector<8x15xf32> to vector<8x5xf32>
    %275 = vector.extract_strided_slice %265 {offsets = [0, 5], sizes = [8, 5], strides = [1, 1]} : vector<8x15xf32> to vector<8x5xf32>
    %276 = arith.addf %274, %275 : vector<8x5xf32>
    %277 = arith.negf %276 : vector<8x5xf32>
    %278 = math.exp %277 : vector<8x5xf32>
    %cst_83 = arith.constant 1.000000e+00 : f32
    %279 = vector.broadcast %cst_83 : f32 to vector<8x5xf32>
    %280 = arith.addf %279, %278 : vector<8x5xf32>
    %281 = arith.divf %279, %280 : vector<8x5xf32>
    %282 = vector.extract_strided_slice %262 {offsets = [0, 10], sizes = [8, 5], strides = [1, 1]} : vector<8x15xf32> to vector<8x5xf32>
    %283 = vector.extract_strided_slice %265 {offsets = [0, 10], sizes = [8, 5], strides = [1, 1]} : vector<8x15xf32> to vector<8x5xf32>
    %284 = arith.mulf %273, %283 : vector<8x5xf32>
    %285 = arith.addf %282, %284 : vector<8x5xf32>
    %286 = math.tanh %285 : vector<8x5xf32>
    %cst_84 = arith.constant 1.000000e+00 : f32
    %287 = vector.broadcast %cst_84 : f32 to vector<8x5xf32>
    %288 = arith.subf %287, %281 : vector<8x5xf32>
    %289 = arith.mulf %288, %286 : vector<8x5xf32>
    %290 = arith.mulf %281, %259 : vector<8x5xf32>
    %291 = arith.addf %289, %290 : vector<8x5xf32>
    %cst_85 = arith.constant dense<0.000000e+00> : vector<8x15xf32>
    %292 = tpu.matmul %214, %219, %cst_85 {dimension_numbers = #tpu.dot_dimension_numbers<[1], [0], [0], [1], [0, 0, 1, 1], [], []>} : vector<8x5xf32>, vector<5x15xf32>, vector<8x15xf32> -> vector<8x15xf32>
    %293 = vector.broadcast %223 : vector<1x15xf32> to vector<8x15xf32>
    %294 = arith.addf %292, %293 : vector<8x15xf32>
    %cst_86 = arith.constant dense<0.000000e+00> : vector<8x15xf32>
    %295 = tpu.matmul %291, %221, %cst_86 {dimension_numbers = #tpu.dot_dimension_numbers<[1], [0], [0], [1], [0, 0, 1, 1], [], []>} : vector<8x5xf32>, vector<5x15xf32>, vector<8x15xf32> -> vector<8x15xf32>
    %296 = vector.broadcast %225 : vector<1x15xf32> to vector<8x15xf32>
    %297 = arith.addf %295, %296 : vector<8x15xf32>
    %298 = vector.extract_strided_slice %294 {offsets = [0, 0], sizes = [8, 5], strides = [1, 1]} : vector<8x15xf32> to vector<8x5xf32>
    %299 = vector.extract_strided_slice %297 {offsets = [0, 0], sizes = [8, 5], strides = [1, 1]} : vector<8x15xf32> to vector<8x5xf32>
    %300 = arith.addf %298, %299 : vector<8x5xf32>
    %301 = arith.negf %300 : vector<8x5xf32>
    %302 = math.exp %301 : vector<8x5xf32>
    %cst_87 = arith.constant 1.000000e+00 : f32
    %303 = vector.broadcast %cst_87 : f32 to vector<8x5xf32>
    %304 = arith.addf %303, %302 : vector<8x5xf32>
    %305 = arith.divf %303, %304 : vector<8x5xf32>
    %306 = vector.extract_strided_slice %294 {offsets = [0, 5], sizes = [8, 5], strides = [1, 1]} : vector<8x15xf32> to vector<8x5xf32>
    %307 = vector.extract_strided_slice %297 {offsets = [0, 5], sizes = [8, 5], strides = [1, 1]} : vector<8x15xf32> to vector<8x5xf32>
    %308 = arith.addf %306, %307 : vector<8x5xf32>
    %309 = arith.negf %308 : vector<8x5xf32>
    %310 = math.exp %309 : vector<8x5xf32>
    %cst_88 = arith.constant 1.000000e+00 : f32
    %311 = vector.broadcast %cst_88 : f32 to vector<8x5xf32>
    %312 = arith.addf %311, %310 : vector<8x5xf32>
    %313 = arith.divf %311, %312 : vector<8x5xf32>
    %314 = vector.extract_strided_slice %294 {offsets = [0, 10], sizes = [8, 5], strides = [1, 1]} : vector<8x15xf32> to vector<8x5xf32>
    %315 = vector.extract_strided_slice %297 {offsets = [0, 10], sizes = [8, 5], strides = [1, 1]} : vector<8x15xf32> to vector<8x5xf32>
    %316 = arith.mulf %305, %315 : vector<8x5xf32>
    %317 = arith.addf %314, %316 : vector<8x5xf32>
    %318 = math.tanh %317 : vector<8x5xf32>
    %cst_89 = arith.constant 1.000000e+00 : f32
    %319 = vector.broadcast %cst_89 : f32 to vector<8x5xf32>
    %320 = arith.subf %319, %313 : vector<8x5xf32>
    %321 = arith.mulf %320, %318 : vector<8x5xf32>
    %322 = arith.mulf %313, %291 : vector<8x5xf32>
    %323 = arith.addf %321, %322 : vector<8x5xf32>
    %c2_90 = arith.constant 2 : index
    %c0_91 = arith.constant 0 : index
    %c0_92 = arith.constant 0 : index
    %324 = vector.load %arg18[%c2_90, %c0_91, %c0_92] : memref<5x8x5xf32, #tpu.memory_space<vmem>>, vector<1x8x5xf32>
    %325 = vector.shape_cast %324 : vector<1x8x5xf32> to vector<8x5xf32>
    %326 = vector.shape_cast %323 : vector<8x5xf32> to vector<1x8x5xf32>
    tpu.vector_store %arg18[%c2_90, %c0_91, %c0_92], %326 {strides = array<i32>} : memref<5x8x5xf32, #tpu.memory_space<vmem>>, vector<1x8x5xf32>,
    %c2_93 = arith.constant 2 : index
    %c0_94 = arith.constant 0 : index
    %c0_95 = arith.constant 0 : index
    %327 = vector.load %arg7[%c2_93, %c0_94, %c0_95] : memref<4x5x15xf32, #tpu.memory_space<vmem>>, vector<1x5x15xf32>
    %328 = vector.shape_cast %327 : vector<1x5x15xf32> to vector<5x15xf32>
    %c2_96 = arith.constant 2 : index
    %c0_97 = arith.constant 0 : index
    %c0_98 = arith.constant 0 : index
    %329 = vector.load %arg8[%c2_96, %c0_97, %c0_98] : memref<4x5x15xf32, #tpu.memory_space<vmem>>, vector<1x5x15xf32>
    %330 = vector.shape_cast %329 : vector<1x5x15xf32> to vector<5x15xf32>
    %c2_99 = arith.constant 2 : index
    %c0_100 = arith.constant 0 : index
    %c0_101 = arith.constant 0 : index
    %331 = vector.load %arg9[%c2_99, %c0_100, %c0_101] : memref<4x1x15xf32, #tpu.memory_space<vmem>>, vector<1x1x15xf32>
    %332 = vector.shape_cast %331 : vector<1x1x15xf32> to vector<1x15xf32>
    %c2_102 = arith.constant 2 : index
    %c0_103 = arith.constant 0 : index
    %c0_104 = arith.constant 0 : index
    %333 = vector.load %arg10[%c2_102, %c0_103, %c0_104] : memref<4x1x15xf32, #tpu.memory_space<vmem>>, vector<1x1x15xf32>
    %334 = vector.shape_cast %333 : vector<1x1x15xf32> to vector<1x15xf32>
    %c3 = arith.constant 3 : index
    %c0_105 = arith.constant 0 : index
    %c0_106 = arith.constant 0 : index
    %335 = vector.load %arg1[%c3, %c0_105, %c0_106] : memref<5x8x5xf32, #tpu.memory_space<vmem>>, vector<1x8x5xf32>
    %336 = vector.shape_cast %335 : vector<1x8x5xf32> to vector<8x5xf32>
    %cst_107 = arith.constant dense<0.000000e+00> : vector<8x15xf32>
    %337 = tpu.matmul %259, %328, %cst_107 {dimension_numbers = #tpu.dot_dimension_numbers<[1], [0], [0], [1], [0, 0, 1, 1], [], []>} : vector<8x5xf32>, vector<5x15xf32>, vector<8x15xf32> -> vector<8x15xf32>
    %338 = vector.broadcast %332 : vector<1x15xf32> to vector<8x15xf32>
    %339 = arith.addf %337, %338 : vector<8x15xf32>
    %cst_108 = arith.constant dense<0.000000e+00> : vector<8x15xf32>
    %340 = tpu.matmul %336, %330, %cst_108 {dimension_numbers = #tpu.dot_dimension_numbers<[1], [0], [0], [1], [0, 0, 1, 1], [], []>} : vector<8x5xf32>, vector<5x15xf32>, vector<8x15xf32> -> vector<8x15xf32>
    %341 = vector.broadcast %334 : vector<1x15xf32> to vector<8x15xf32>
    %342 = arith.addf %340, %341 : vector<8x15xf32>
    %343 = vector.extract_strided_slice %339 {offsets = [0, 0], sizes = [8, 5], strides = [1, 1]} : vector<8x15xf32> to vector<8x5xf32>
    %344 = vector.extract_strided_slice %342 {offsets = [0, 0], sizes = [8, 5], strides = [1, 1]} : vector<8x15xf32> to vector<8x5xf32>
    %345 = arith.addf %343, %344 : vector<8x5xf32>
    %346 = arith.negf %345 : vector<8x5xf32>
    %347 = math.exp %346 : vector<8x5xf32>
    %cst_109 = arith.constant 1.000000e+00 : f32
    %348 = vector.broadcast %cst_109 : f32 to vector<8x5xf32>
    %349 = arith.addf %348, %347 : vector<8x5xf32>
    %350 = arith.divf %348, %349 : vector<8x5xf32>
    %351 = vector.extract_strided_slice %339 {offsets = [0, 5], sizes = [8, 5], strides = [1, 1]} : vector<8x15xf32> to vector<8x5xf32>
    %352 = vector.extract_strided_slice %342 {offsets = [0, 5], sizes = [8, 5], strides = [1, 1]} : vector<8x15xf32> to vector<8x5xf32>
    %353 = arith.addf %351, %352 : vector<8x5xf32>
    %354 = arith.negf %353 : vector<8x5xf32>
    %355 = math.exp %354 : vector<8x5xf32>
    %cst_110 = arith.constant 1.000000e+00 : f32
    %356 = vector.broadcast %cst_110 : f32 to vector<8x5xf32>
    %357 = arith.addf %356, %355 : vector<8x5xf32>
    %358 = arith.divf %356, %357 : vector<8x5xf32>
    %359 = vector.extract_strided_slice %339 {offsets = [0, 10], sizes = [8, 5], strides = [1, 1]} : vector<8x15xf32> to vector<8x5xf32>
    %360 = vector.extract_strided_slice %342 {offsets = [0, 10], sizes = [8, 5], strides = [1, 1]} : vector<8x15xf32> to vector<8x5xf32>
    %361 = arith.mulf %350, %360 : vector<8x5xf32>
    %362 = arith.addf %359, %361 : vector<8x5xf32>
    %363 = math.tanh %362 : vector<8x5xf32>
    %cst_111 = arith.constant 1.000000e+00 : f32
    %364 = vector.broadcast %cst_111 : f32 to vector<8x5xf32>
    %365 = arith.subf %364, %358 : vector<8x5xf32>
    %366 = arith.mulf %365, %363 : vector<8x5xf32>
    %367 = arith.mulf %358, %336 : vector<8x5xf32>
    %368 = arith.addf %366, %367 : vector<8x5xf32>
    %cst_112 = arith.constant dense<0.000000e+00> : vector<8x15xf32>
    %369 = tpu.matmul %291, %328, %cst_112 {dimension_numbers = #tpu.dot_dimension_numbers<[1], [0], [0], [1], [0, 0, 1, 1], [], []>} : vector<8x5xf32>, vector<5x15xf32>, vector<8x15xf32> -> vector<8x15xf32>
    %370 = vector.broadcast %332 : vector<1x15xf32> to vector<8x15xf32>
    %371 = arith.addf %369, %370 : vector<8x15xf32>
    %cst_113 = arith.constant dense<0.000000e+00> : vector<8x15xf32>
    %372 = tpu.matmul %368, %330, %cst_113 {dimension_numbers = #tpu.dot_dimension_numbers<[1], [0], [0], [1], [0, 0, 1, 1], [], []>} : vector<8x5xf32>, vector<5x15xf32>, vector<8x15xf32> -> vector<8x15xf32>
    %373 = vector.broadcast %334 : vector<1x15xf32> to vector<8x15xf32>
    %374 = arith.addf %372, %373 : vector<8x15xf32>
    %375 = vector.extract_strided_slice %371 {offsets = [0, 0], sizes = [8, 5], strides = [1, 1]} : vector<8x15xf32> to vector<8x5xf32>
    %376 = vector.extract_strided_slice %374 {offsets = [0, 0], sizes = [8, 5], strides = [1, 1]} : vector<8x15xf32> to vector<8x5xf32>
    %377 = arith.addf %375, %376 : vector<8x5xf32>
    %378 = arith.negf %377 : vector<8x5xf32>
    %379 = math.exp %378 : vector<8x5xf32>
    %cst_114 = arith.constant 1.000000e+00 : f32
    %380 = vector.broadcast %cst_114 : f32 to vector<8x5xf32>
    %381 = arith.addf %380, %379 : vector<8x5xf32>
    %382 = arith.divf %380, %381 : vector<8x5xf32>
    %383 = vector.extract_strided_slice %371 {offsets = [0, 5], sizes = [8, 5], strides = [1, 1]} : vector<8x15xf32> to vector<8x5xf32>
    %384 = vector.extract_strided_slice %374 {offsets = [0, 5], sizes = [8, 5], strides = [1, 1]} : vector<8x15xf32> to vector<8x5xf32>
    %385 = arith.addf %383, %384 : vector<8x5xf32>
    %386 = arith.negf %385 : vector<8x5xf32>
    %387 = math.exp %386 : vector<8x5xf32>
    %cst_115 = arith.constant 1.000000e+00 : f32
    %388 = vector.broadcast %cst_115 : f32 to vector<8x5xf32>
    %389 = arith.addf %388, %387 : vector<8x5xf32>
    %390 = arith.divf %388, %389 : vector<8x5xf32>
    %391 = vector.extract_strided_slice %371 {offsets = [0, 10], sizes = [8, 5], strides = [1, 1]} : vector<8x15xf32> to vector<8x5xf32>
    %392 = vector.extract_strided_slice %374 {offsets = [0, 10], sizes = [8, 5], strides = [1, 1]} : vector<8x15xf32> to vector<8x5xf32>
    %393 = arith.mulf %382, %392 : vector<8x5xf32>
    %394 = arith.addf %391, %393 : vector<8x5xf32>
    %395 = math.tanh %394 : vector<8x5xf32>
    %cst_116 = arith.constant 1.000000e+00 : f32
    %396 = vector.broadcast %cst_116 : f32 to vector<8x5xf32>
    %397 = arith.subf %396, %390 : vector<8x5xf32>
    %398 = arith.mulf %397, %395 : vector<8x5xf32>
    %399 = arith.mulf %390, %368 : vector<8x5xf32>
    %400 = arith.addf %398, %399 : vector<8x5xf32>
    %cst_117 = arith.constant dense<0.000000e+00> : vector<8x15xf32>
    %401 = tpu.matmul %323, %328, %cst_117 {dimension_numbers = #tpu.dot_dimension_numbers<[1], [0], [0], [1], [0, 0, 1, 1], [], []>} : vector<8x5xf32>, vector<5x15xf32>, vector<8x15xf32> -> vector<8x15xf32>
    %402 = vector.broadcast %332 : vector<1x15xf32> to vector<8x15xf32>
    %403 = arith.addf %401, %402 : vector<8x15xf32>
    %cst_118 = arith.constant dense<0.000000e+00> : vector<8x15xf32>
    %404 = tpu.matmul %400, %330, %cst_118 {dimension_numbers = #tpu.dot_dimension_numbers<[1], [0], [0], [1], [0, 0, 1, 1], [], []>} : vector<8x5xf32>, vector<5x15xf32>, vector<8x15xf32> -> vector<8x15xf32>
    %405 = vector.broadcast %334 : vector<1x15xf32> to vector<8x15xf32>
    %406 = arith.addf %404, %405 : vector<8x15xf32>
    %407 = vector.extract_strided_slice %403 {offsets = [0, 0], sizes = [8, 5], strides = [1, 1]} : vector<8x15xf32> to vector<8x5xf32>
    %408 = vector.extract_strided_slice %406 {offsets = [0, 0], sizes = [8, 5], strides = [1, 1]} : vector<8x15xf32> to vector<8x5xf32>
    %409 = arith.addf %407, %408 : vector<8x5xf32>
    %410 = arith.negf %409 : vector<8x5xf32>
    %411 = math.exp %410 : vector<8x5xf32>
    %cst_119 = arith.constant 1.000000e+00 : f32
    %412 = vector.broadcast %cst_119 : f32 to vector<8x5xf32>
    %413 = arith.addf %412, %411 : vector<8x5xf32>
    %414 = arith.divf %412, %413 : vector<8x5xf32>
    %415 = vector.extract_strided_slice %403 {offsets = [0, 5], sizes = [8, 5], strides = [1, 1]} : vector<8x15xf32> to vector<8x5xf32>
    %416 = vector.extract_strided_slice %406 {offsets = [0, 5], sizes = [8, 5], strides = [1, 1]} : vector<8x15xf32> to vector<8x5xf32>
    %417 = arith.addf %415, %416 : vector<8x5xf32>
    %418 = arith.negf %417 : vector<8x5xf32>
    %419 = math.exp %418 : vector<8x5xf32>
    %cst_120 = arith.constant 1.000000e+00 : f32
    %420 = vector.broadcast %cst_120 : f32 to vector<8x5xf32>
    %421 = arith.addf %420, %419 : vector<8x5xf32>
    %422 = arith.divf %420, %421 : vector<8x5xf32>
    %423 = vector.extract_strided_slice %403 {offsets = [0, 10], sizes = [8, 5], strides = [1, 1]} : vector<8x15xf32> to vector<8x5xf32>
    %424 = vector.extract_strided_slice %406 {offsets = [0, 10], sizes = [8, 5], strides = [1, 1]} : vector<8x15xf32> to vector<8x5xf32>
    %425 = arith.mulf %414, %424 : vector<8x5xf32>
    %426 = arith.addf %423, %425 : vector<8x5xf32>
    %427 = math.tanh %426 : vector<8x5xf32>
    %cst_121 = arith.constant 1.000000e+00 : f32
    %428 = vector.broadcast %cst_121 : f32 to vector<8x5xf32>
    %429 = arith.subf %428, %422 : vector<8x5xf32>
    %430 = arith.mulf %429, %427 : vector<8x5xf32>
    %431 = arith.mulf %422, %400 : vector<8x5xf32>
    %432 = arith.addf %430, %431 : vector<8x5xf32>
    %c3_122 = arith.constant 3 : index
    %c0_123 = arith.constant 0 : index
    %c0_124 = arith.constant 0 : index
    %433 = vector.load %arg18[%c3_122, %c0_123, %c0_124] : memref<5x8x5xf32, #tpu.memory_space<vmem>>, vector<1x8x5xf32>
    %434 = vector.shape_cast %433 : vector<1x8x5xf32> to vector<8x5xf32>
    %435 = vector.shape_cast %432 : vector<8x5xf32> to vector<1x8x5xf32>
    tpu.vector_store %arg18[%c3_122, %c0_123, %c0_124], %435 {strides = array<i32>} : memref<5x8x5xf32, #tpu.memory_space<vmem>>, vector<1x8x5xf32>,
    %c3_125 = arith.constant 3 : index
    %c0_126 = arith.constant 0 : index
    %c0_127 = arith.constant 0 : index
    %436 = vector.load %arg7[%c3_125, %c0_126, %c0_127] : memref<4x5x15xf32, #tpu.memory_space<vmem>>, vector<1x5x15xf32>
    %437 = vector.shape_cast %436 : vector<1x5x15xf32> to vector<5x15xf32>
    %c3_128 = arith.constant 3 : index
    %c0_129 = arith.constant 0 : index
    %c0_130 = arith.constant 0 : index
    %438 = vector.load %arg8[%c3_128, %c0_129, %c0_130] : memref<4x5x15xf32, #tpu.memory_space<vmem>>, vector<1x5x15xf32>
    %439 = vector.shape_cast %438 : vector<1x5x15xf32> to vector<5x15xf32>
    %c3_131 = arith.constant 3 : index
    %c0_132 = arith.constant 0 : index
    %c0_133 = arith.constant 0 : index
    %440 = vector.load %arg9[%c3_131, %c0_132, %c0_133] : memref<4x1x15xf32, #tpu.memory_space<vmem>>, vector<1x1x15xf32>
    %441 = vector.shape_cast %440 : vector<1x1x15xf32> to vector<1x15xf32>
    %c3_134 = arith.constant 3 : index
    %c0_135 = arith.constant 0 : index
    %c0_136 = arith.constant 0 : index
    %442 = vector.load %arg10[%c3_134, %c0_135, %c0_136] : memref<4x1x15xf32, #tpu.memory_space<vmem>>, vector<1x1x15xf32>
    %443 = vector.shape_cast %442 : vector<1x1x15xf32> to vector<1x15xf32>
    %c4 = arith.constant 4 : index
    %c0_137 = arith.constant 0 : index
    %c0_138 = arith.constant 0 : index
    %444 = vector.load %arg1[%c4, %c0_137, %c0_138] : memref<5x8x5xf32, #tpu.memory_space<vmem>>, vector<1x8x5xf32>
    %445 = vector.shape_cast %444 : vector<1x8x5xf32> to vector<8x5xf32>
    %cst_139 = arith.constant dense<0.000000e+00> : vector<8x15xf32>
    %446 = tpu.matmul %368, %437, %cst_139 {dimension_numbers = #tpu.dot_dimension_numbers<[1], [0], [0], [1], [0, 0, 1, 1], [], []>} : vector<8x5xf32>, vector<5x15xf32>, vector<8x15xf32> -> vector<8x15xf32>
    %447 = vector.broadcast %441 : vector<1x15xf32> to vector<8x15xf32>
    %448 = arith.addf %446, %447 : vector<8x15xf32>
    %cst_140 = arith.constant dense<0.000000e+00> : vector<8x15xf32>
    %449 = tpu.matmul %445, %439, %cst_140 {dimension_numbers = #tpu.dot_dimension_numbers<[1], [0], [0], [1], [0, 0, 1, 1], [], []>} : vector<8x5xf32>, vector<5x15xf32>, vector<8x15xf32> -> vector<8x15xf32>
    %450 = vector.broadcast %443 : vector<1x15xf32> to vector<8x15xf32>
    %451 = arith.addf %449, %450 : vector<8x15xf32>
    %452 = vector.extract_strided_slice %448 {offsets = [0, 0], sizes = [8, 5], strides = [1, 1]} : vector<8x15xf32> to vector<8x5xf32>
    %453 = vector.extract_strided_slice %451 {offsets = [0, 0], sizes = [8, 5], strides = [1, 1]} : vector<8x15xf32> to vector<8x5xf32>
    %454 = arith.addf %452, %453 : vector<8x5xf32>
    %455 = arith.negf %454 : vector<8x5xf32>
    %456 = math.exp %455 : vector<8x5xf32>
    %cst_141 = arith.constant 1.000000e+00 : f32
    %457 = vector.broadcast %cst_141 : f32 to vector<8x5xf32>
    %458 = arith.addf %457, %456 : vector<8x5xf32>
    %459 = arith.divf %457, %458 : vector<8x5xf32>
    %460 = vector.extract_strided_slice %448 {offsets = [0, 5], sizes = [8, 5], strides = [1, 1]} : vector<8x15xf32> to vector<8x5xf32>
    %461 = vector.extract_strided_slice %451 {offsets = [0, 5], sizes = [8, 5], strides = [1, 1]} : vector<8x15xf32> to vector<8x5xf32>
    %462 = arith.addf %460, %461 : vector<8x5xf32>
    %463 = arith.negf %462 : vector<8x5xf32>
    %464 = math.exp %463 : vector<8x5xf32>
    %cst_142 = arith.constant 1.000000e+00 : f32
    %465 = vector.broadcast %cst_142 : f32 to vector<8x5xf32>
    %466 = arith.addf %465, %464 : vector<8x5xf32>
    %467 = arith.divf %465, %466 : vector<8x5xf32>
    %468 = vector.extract_strided_slice %448 {offsets = [0, 10], sizes = [8, 5], strides = [1, 1]} : vector<8x15xf32> to vector<8x5xf32>
    %469 = vector.extract_strided_slice %451 {offsets = [0, 10], sizes = [8, 5], strides = [1, 1]} : vector<8x15xf32> to vector<8x5xf32>
    %470 = arith.mulf %459, %469 : vector<8x5xf32>
    %471 = arith.addf %468, %470 : vector<8x5xf32>
    %472 = math.tanh %471 : vector<8x5xf32>
    %cst_143 = arith.constant 1.000000e+00 : f32
    %473 = vector.broadcast %cst_143 : f32 to vector<8x5xf32>
    %474 = arith.subf %473, %467 : vector<8x5xf32>
    %475 = arith.mulf %474, %472 : vector<8x5xf32>
    %476 = arith.mulf %467, %445 : vector<8x5xf32>
    %477 = arith.addf %475, %476 : vector<8x5xf32>
    %cst_144 = arith.constant dense<0.000000e+00> : vector<8x15xf32>
    %478 = tpu.matmul %400, %437, %cst_144 {dimension_numbers = #tpu.dot_dimension_numbers<[1], [0], [0], [1], [0, 0, 1, 1], [], []>} : vector<8x5xf32>, vector<5x15xf32>, vector<8x15xf32> -> vector<8x15xf32>
    %479 = vector.broadcast %441 : vector<1x15xf32> to vector<8x15xf32>
    %480 = arith.addf %478, %479 : vector<8x15xf32>
    %cst_145 = arith.constant dense<0.000000e+00> : vector<8x15xf32>
    %481 = tpu.matmul %477, %439, %cst_145 {dimension_numbers = #tpu.dot_dimension_numbers<[1], [0], [0], [1], [0, 0, 1, 1], [], []>} : vector<8x5xf32>, vector<5x15xf32>, vector<8x15xf32> -> vector<8x15xf32>
    %482 = vector.broadcast %443 : vector<1x15xf32> to vector<8x15xf32>
    %483 = arith.addf %481, %482 : vector<8x15xf32>
    %484 = vector.extract_strided_slice %480 {offsets = [0, 0], sizes = [8, 5], strides = [1, 1]} : vector<8x15xf32> to vector<8x5xf32>
    %485 = vector.extract_strided_slice %483 {offsets = [0, 0], sizes = [8, 5], strides = [1, 1]} : vector<8x15xf32> to vector<8x5xf32>
    %486 = arith.addf %484, %485 : vector<8x5xf32>
    %487 = arith.negf %486 : vector<8x5xf32>
    %488 = math.exp %487 : vector<8x5xf32>
    %cst_146 = arith.constant 1.000000e+00 : f32
    %489 = vector.broadcast %cst_146 : f32 to vector<8x5xf32>
    %490 = arith.addf %489, %488 : vector<8x5xf32>
    %491 = arith.divf %489, %490 : vector<8x5xf32>
    %492 = vector.extract_strided_slice %480 {offsets = [0, 5], sizes = [8, 5], strides = [1, 1]} : vector<8x15xf32> to vector<8x5xf32>
    %493 = vector.extract_strided_slice %483 {offsets = [0, 5], sizes = [8, 5], strides = [1, 1]} : vector<8x15xf32> to vector<8x5xf32>
    %494 = arith.addf %492, %493 : vector<8x5xf32>
    %495 = arith.negf %494 : vector<8x5xf32>
    %496 = math.exp %495 : vector<8x5xf32>
    %cst_147 = arith.constant 1.000000e+00 : f32
    %497 = vector.broadcast %cst_147 : f32 to vector<8x5xf32>
    %498 = arith.addf %497, %496 : vector<8x5xf32>
    %499 = arith.divf %497, %498 : vector<8x5xf32>
    %500 = vector.extract_strided_slice %480 {offsets = [0, 10], sizes = [8, 5], strides = [1, 1]} : vector<8x15xf32> to vector<8x5xf32>
    %501 = vector.extract_strided_slice %483 {offsets = [0, 10], sizes = [8, 5], strides = [1, 1]} : vector<8x15xf32> to vector<8x5xf32>
    %502 = arith.mulf %491, %501 : vector<8x5xf32>
    %503 = arith.addf %500, %502 : vector<8x5xf32>
    %504 = math.tanh %503 : vector<8x5xf32>
    %cst_148 = arith.constant 1.000000e+00 : f32
    %505 = vector.broadcast %cst_148 : f32 to vector<8x5xf32>
    %506 = arith.subf %505, %499 : vector<8x5xf32>
    %507 = arith.mulf %506, %504 : vector<8x5xf32>
    %508 = arith.mulf %499, %477 : vector<8x5xf32>
    %509 = arith.addf %507, %508 : vector<8x5xf32>
    %cst_149 = arith.constant dense<0.000000e+00> : vector<8x15xf32>
    %510 = tpu.matmul %432, %437, %cst_149 {dimension_numbers = #tpu.dot_dimension_numbers<[1], [0], [0], [1], [0, 0, 1, 1], [], []>} : vector<8x5xf32>, vector<5x15xf32>, vector<8x15xf32> -> vector<8x15xf32>
    %511 = vector.broadcast %441 : vector<1x15xf32> to vector<8x15xf32>
    %512 = arith.addf %510, %511 : vector<8x15xf32>
    %cst_150 = arith.constant dense<0.000000e+00> : vector<8x15xf32>
    %513 = tpu.matmul %509, %439, %cst_150 {dimension_numbers = #tpu.dot_dimension_numbers<[1], [0], [0], [1], [0, 0, 1, 1], [], []>} : vector<8x5xf32>, vector<5x15xf32>, vector<8x15xf32> -> vector<8x15xf32>
    %514 = vector.broadcast %443 : vector<1x15xf32> to vector<8x15xf32>
    %515 = arith.addf %513, %514 : vector<8x15xf32>
    %516 = vector.extract_strided_slice %512 {offsets = [0, 0], sizes = [8, 5], strides = [1, 1]} : vector<8x15xf32> to vector<8x5xf32>
    %517 = vector.extract_strided_slice %515 {offsets = [0, 0], sizes = [8, 5], strides = [1, 1]} : vector<8x15xf32> to vector<8x5xf32>
    %518 = arith.addf %516, %517 : vector<8x5xf32>
    %519 = arith.negf %518 : vector<8x5xf32>
    %520 = math.exp %519 : vector<8x5xf32>
    %cst_151 = arith.constant 1.000000e+00 : f32
    %521 = vector.broadcast %cst_151 : f32 to vector<8x5xf32>
    %522 = arith.addf %521, %520 : vector<8x5xf32>
    %523 = arith.divf %521, %522 : vector<8x5xf32>
    %524 = vector.extract_strided_slice %512 {offsets = [0, 5], sizes = [8, 5], strides = [1, 1]} : vector<8x15xf32> to vector<8x5xf32>
    %525 = vector.extract_strided_slice %515 {offsets = [0, 5], sizes = [8, 5], strides = [1, 1]} : vector<8x15xf32> to vector<8x5xf32>
    %526 = arith.addf %524, %525 : vector<8x5xf32>
    %527 = arith.negf %526 : vector<8x5xf32>
    %528 = math.exp %527 : vector<8x5xf32>
    %cst_152 = arith.constant 1.000000e+00 : f32
    %529 = vector.broadcast %cst_152 : f32 to vector<8x5xf32>
    %530 = arith.addf %529, %528 : vector<8x5xf32>
    %531 = arith.divf %529, %530 : vector<8x5xf32>
    %532 = vector.extract_strided_slice %512 {offsets = [0, 10], sizes = [8, 5], strides = [1, 1]} : vector<8x15xf32> to vector<8x5xf32>
    %533 = vector.extract_strided_slice %515 {offsets = [0, 10], sizes = [8, 5], strides = [1, 1]} : vector<8x15xf32> to vector<8x5xf32>
    %534 = arith.mulf %523, %533 : vector<8x5xf32>
    %535 = arith.addf %532, %534 : vector<8x5xf32>
    %536 = math.tanh %535 : vector<8x5xf32>
    %cst_153 = arith.constant 1.000000e+00 : f32
    %537 = vector.broadcast %cst_153 : f32 to vector<8x5xf32>
    %538 = arith.subf %537, %531 : vector<8x5xf32>
    %539 = arith.mulf %538, %536 : vector<8x5xf32>
    %540 = arith.mulf %531, %509 : vector<8x5xf32>
    %541 = arith.addf %539, %540 : vector<8x5xf32>
    %c4_154 = arith.constant 4 : index
    %c0_155 = arith.constant 0 : index
    %c0_156 = arith.constant 0 : index
    %542 = vector.load %arg18[%c4_154, %c0_155, %c0_156] : memref<5x8x5xf32, #tpu.memory_space<vmem>>, vector<1x8x5xf32>
    %543 = vector.shape_cast %542 : vector<1x8x5xf32> to vector<8x5xf32>
    %544 = vector.shape_cast %541 : vector<8x5xf32> to vector<1x8x5xf32>
    tpu.vector_store %arg18[%c4_154, %c0_155, %c0_156], %544 {strides = array<i32>} : memref<5x8x5xf32, #tpu.memory_space<vmem>>, vector<1x8x5xf32>,
    %c0_157 = arith.constant 0 : index
    %c0_158 = arith.constant 0 : index
    %545 = vector.load %arg12[%c0_157, %c0_158] : memref<6x36xf32, #tpu.memory_space<vmem>>, vector<6x36xf32>
    %cst_159 = arith.constant dense<0.000000e+00> : vector<8x36xf32>
    %546 = tpu.matmul %0, %545, %cst_159 {dimension_numbers = #tpu.dot_dimension_numbers<[1], [0], [0], [1], [0, 0, 1, 1], [], []>} : vector<8x6xf32>, vector<6x36xf32>, vector<8x36xf32> -> vector<8x36xf32>
    %c0_160 = arith.constant 0 : index
    %c0_161 = arith.constant 0 : index
    %c0_162 = arith.constant 0 : index
    %547 = vector.load %arg1[%c0_160, %c0_161, %c0_162] : memref<5x8x5xf32, #tpu.memory_space<vmem>>, vector<1x8x5xf32>
    %548 = vector.shape_cast %547 : vector<1x8x5xf32> to vector<8x5xf32>
    %c0_163 = arith.constant 0 : index
    %c0_164 = arith.constant 0 : index
    %c0_165 = arith.constant 0 : index
    %549 = vector.load %arg11[%c0_163, %c0_164, %c0_165] : memref<5x5x36xf32, #tpu.memory_space<vmem>>, vector<1x5x36xf32>
    %550 = vector.shape_cast %549 : vector<1x5x36xf32> to vector<5x36xf32>
    %cst_166 = arith.constant dense<0.000000e+00> : vector<8x36xf32>
    %551 = tpu.matmul %548, %550, %cst_166 {dimension_numbers = #tpu.dot_dimension_numbers<[1], [0], [0], [1], [0, 0, 1, 1], [], []>} : vector<8x5xf32>, vector<5x36xf32>, vector<8x36xf32> -> vector<8x36xf32>
    %552 = arith.addf %546, %551 : vector<8x36xf32>
    %c1_167 = arith.constant 1 : index
    %c0_168 = arith.constant 0 : index
    %c0_169 = arith.constant 0 : index
    %553 = vector.load %arg1[%c1_167, %c0_168, %c0_169] : memref<5x8x5xf32, #tpu.memory_space<vmem>>, vector<1x8x5xf32>
    %554 = vector.shape_cast %553 : vector<1x8x5xf32> to vector<8x5xf32>
    %c1_170 = arith.constant 1 : index
    %c0_171 = arith.constant 0 : index
    %c0_172 = arith.constant 0 : index
    %555 = vector.load %arg11[%c1_170, %c0_171, %c0_172] : memref<5x5x36xf32, #tpu.memory_space<vmem>>, vector<1x5x36xf32>
    %556 = vector.shape_cast %555 : vector<1x5x36xf32> to vector<5x36xf32>
    %cst_173 = arith.constant dense<0.000000e+00> : vector<8x36xf32>
    %557 = tpu.matmul %554, %556, %cst_173 {dimension_numbers = #tpu.dot_dimension_numbers<[1], [0], [0], [1], [0, 0, 1, 1], [], []>} : vector<8x5xf32>, vector<5x36xf32>, vector<8x36xf32> -> vector<8x36xf32>
    %558 = arith.addf %552, %557 : vector<8x36xf32>
    %c2_174 = arith.constant 2 : index
    %c0_175 = arith.constant 0 : index
    %c0_176 = arith.constant 0 : index
    %559 = vector.load %arg1[%c2_174, %c0_175, %c0_176] : memref<5x8x5xf32, #tpu.memory_space<vmem>>, vector<1x8x5xf32>
    %560 = vector.shape_cast %559 : vector<1x8x5xf32> to vector<8x5xf32>
    %c2_177 = arith.constant 2 : index
    %c0_178 = arith.constant 0 : index
    %c0_179 = arith.constant 0 : index
    %561 = vector.load %arg11[%c2_177, %c0_178, %c0_179] : memref<5x5x36xf32, #tpu.memory_space<vmem>>, vector<1x5x36xf32>
    %562 = vector.shape_cast %561 : vector<1x5x36xf32> to vector<5x36xf32>
    %cst_180 = arith.constant dense<0.000000e+00> : vector<8x36xf32>
    %563 = tpu.matmul %560, %562, %cst_180 {dimension_numbers = #tpu.dot_dimension_numbers<[1], [0], [0], [1], [0, 0, 1, 1], [], []>} : vector<8x5xf32>, vector<5x36xf32>, vector<8x36xf32> -> vector<8x36xf32>
    %564 = arith.addf %558, %563 : vector<8x36xf32>
    %c3_181 = arith.constant 3 : index
    %c0_182 = arith.constant 0 : index
    %c0_183 = arith.constant 0 : index
    %565 = vector.load %arg1[%c3_181, %c0_182, %c0_183] : memref<5x8x5xf32, #tpu.memory_space<vmem>>, vector<1x8x5xf32>
    %566 = vector.shape_cast %565 : vector<1x8x5xf32> to vector<8x5xf32>
    %c3_184 = arith.constant 3 : index
    %c0_185 = arith.constant 0 : index
    %c0_186 = arith.constant 0 : index
    %567 = vector.load %arg11[%c3_184, %c0_185, %c0_186] : memref<5x5x36xf32, #tpu.memory_space<vmem>>, vector<1x5x36xf32>
    %568 = vector.shape_cast %567 : vector<1x5x36xf32> to vector<5x36xf32>
    %cst_187 = arith.constant dense<0.000000e+00> : vector<8x36xf32>
    %569 = tpu.matmul %566, %568, %cst_187 {dimension_numbers = #tpu.dot_dimension_numbers<[1], [0], [0], [1], [0, 0, 1, 1], [], []>} : vector<8x5xf32>, vector<5x36xf32>, vector<8x36xf32> -> vector<8x36xf32>
    %570 = arith.addf %564, %569 : vector<8x36xf32>
    %c4_188 = arith.constant 4 : index
    %c0_189 = arith.constant 0 : index
    %c0_190 = arith.constant 0 : index
    %571 = vector.load %arg1[%c4_188, %c0_189, %c0_190] : memref<5x8x5xf32, #tpu.memory_space<vmem>>, vector<1x8x5xf32>
    %572 = vector.shape_cast %571 : vector<1x8x5xf32> to vector<8x5xf32>
    %c4_191 = arith.constant 4 : index
    %c0_192 = arith.constant 0 : index
    %c0_193 = arith.constant 0 : index
    %573 = vector.load %arg11[%c4_191, %c0_192, %c0_193] : memref<5x5x36xf32, #tpu.memory_space<vmem>>, vector<1x5x36xf32>
    %574 = vector.shape_cast %573 : vector<1x5x36xf32> to vector<5x36xf32>
    %cst_194 = arith.constant dense<0.000000e+00> : vector<8x36xf32>
    %575 = tpu.matmul %572, %574, %cst_194 {dimension_numbers = #tpu.dot_dimension_numbers<[1], [0], [0], [1], [0, 0, 1, 1], [], []>} : vector<8x5xf32>, vector<5x36xf32>, vector<8x36xf32> -> vector<8x36xf32>
    %576 = arith.addf %570, %575 : vector<8x36xf32>
    %c0_195 = arith.constant 0 : index
    %c0_196 = arith.constant 0 : index
    %577 = vector.load %arg13[%c0_195, %c0_196] : memref<1x36xf32, #tpu.memory_space<vmem>>, vector<1x36xf32>
    %578 = vector.broadcast %577 : vector<1x36xf32> to vector<8x36xf32>
    %579 = arith.addf %576, %578 : vector<8x36xf32>
    %580 = arith.negf %579 : vector<8x36xf32>
    %581 = math.exp %580 : vector<8x36xf32>
    %cst_197 = arith.constant 1.000000e+00 : f32
    %582 = vector.broadcast %cst_197 : f32 to vector<8x36xf32>
    %583 = arith.addf %582, %581 : vector<8x36xf32>
    %584 = arith.divf %582, %583 : vector<8x36xf32>
    %585 = arith.mulf %579, %584 : vector<8x36xf32>
    %c0_198 = arith.constant 0 : index
    %c0_199 = arith.constant 0 : index
    %c0_200 = arith.constant 0 : index
    %586 = vector.load %arg14[%c0_198, %c0_199, %c0_200] : memref<4x36x36xf32, #tpu.memory_space<vmem>>, vector<1x36x36xf32>
    %587 = vector.shape_cast %586 : vector<1x36x36xf32> to vector<36x36xf32>
    %cst_201 = arith.constant dense<0.000000e+00> : vector<8x36xf32>
    %588 = tpu.matmul %585, %587, %cst_201 {dimension_numbers = #tpu.dot_dimension_numbers<[1], [0], [0], [1], [0, 0, 1, 1], [], []>} : vector<8x36xf32>, vector<36x36xf32>, vector<8x36xf32> -> vector<8x36xf32>
    %c0_202 = arith.constant 0 : index
    %c0_203 = arith.constant 0 : index
    %c0_204 = arith.constant 0 : index
    %589 = vector.load %arg15[%c0_202, %c0_203, %c0_204] : memref<4x1x36xf32, #tpu.memory_space<vmem>>, vector<1x1x36xf32>
    %590 = vector.shape_cast %589 : vector<1x1x36xf32> to vector<1x36xf32>
    %591 = vector.broadcast %590 : vector<1x36xf32> to vector<8x36xf32>
    %592 = arith.addf %588, %591 : vector<8x36xf32>
    %593 = arith.negf %592 : vector<8x36xf32>
    %594 = math.exp %593 : vector<8x36xf32>
    %cst_205 = arith.constant 1.000000e+00 : f32
    %595 = vector.broadcast %cst_205 : f32 to vector<8x36xf32>
    %596 = arith.addf %595, %594 : vector<8x36xf32>
    %597 = arith.divf %595, %596 : vector<8x36xf32>
    %598 = arith.mulf %592, %597 : vector<8x36xf32>
    %c1_206 = arith.constant 1 : index
    %c0_207 = arith.constant 0 : index
    %c0_208 = arith.constant 0 : index
    %599 = vector.load %arg14[%c1_206, %c0_207, %c0_208] : memref<4x36x36xf32, #tpu.memory_space<vmem>>, vector<1x36x36xf32>
    %600 = vector.shape_cast %599 : vector<1x36x36xf32> to vector<36x36xf32>
    %cst_209 = arith.constant dense<0.000000e+00> : vector<8x36xf32>
    %601 = tpu.matmul %598, %600, %cst_209 {dimension_numbers = #tpu.dot_dimension_numbers<[1], [0], [0], [1], [0, 0, 1, 1], [], []>} : vector<8x36xf32>, vector<36x36xf32>, vector<8x36xf32> -> vector<8x36xf32>
    %c1_210 = arith.constant 1 : index
    %c0_211 = arith.constant 0 : index
    %c0_212 = arith.constant 0 : index
    %602 = vector.load %arg15[%c1_210, %c0_211, %c0_212] : memref<4x1x36xf32, #tpu.memory_space<vmem>>, vector<1x1x36xf32>
    %603 = vector.shape_cast %602 : vector<1x1x36xf32> to vector<1x36xf32>
    %604 = vector.broadcast %603 : vector<1x36xf32> to vector<8x36xf32>
    %605 = arith.addf %601, %604 : vector<8x36xf32>
    %606 = arith.negf %605 : vector<8x36xf32>
    %607 = math.exp %606 : vector<8x36xf32>
    %cst_213 = arith.constant 1.000000e+00 : f32
    %608 = vector.broadcast %cst_213 : f32 to vector<8x36xf32>
    %609 = arith.addf %608, %607 : vector<8x36xf32>
    %610 = arith.divf %608, %609 : vector<8x36xf32>
    %611 = arith.mulf %605, %610 : vector<8x36xf32>
    %c2_214 = arith.constant 2 : index
    %c0_215 = arith.constant 0 : index
    %c0_216 = arith.constant 0 : index
    %612 = vector.load %arg14[%c2_214, %c0_215, %c0_216] : memref<4x36x36xf32, #tpu.memory_space<vmem>>, vector<1x36x36xf32>
    %613 = vector.shape_cast %612 : vector<1x36x36xf32> to vector<36x36xf32>
    %cst_217 = arith.constant dense<0.000000e+00> : vector<8x36xf32>
    %614 = tpu.matmul %611, %613, %cst_217 {dimension_numbers = #tpu.dot_dimension_numbers<[1], [0], [0], [1], [0, 0, 1, 1], [], []>} : vector<8x36xf32>, vector<36x36xf32>, vector<8x36xf32> -> vector<8x36xf32>
    %c2_218 = arith.constant 2 : index
    %c0_219 = arith.constant 0 : index
    %c0_220 = arith.constant 0 : index
    %615 = vector.load %arg15[%c2_218, %c0_219, %c0_220] : memref<4x1x36xf32, #tpu.memory_space<vmem>>, vector<1x1x36xf32>
    %616 = vector.shape_cast %615 : vector<1x1x36xf32> to vector<1x36xf32>
    %617 = vector.broadcast %616 : vector<1x36xf32> to vector<8x36xf32>
    %618 = arith.addf %614, %617 : vector<8x36xf32>
    %619 = arith.negf %618 : vector<8x36xf32>
    %620 = math.exp %619 : vector<8x36xf32>
    %cst_221 = arith.constant 1.000000e+00 : f32
    %621 = vector.broadcast %cst_221 : f32 to vector<8x36xf32>
    %622 = arith.addf %621, %620 : vector<8x36xf32>
    %623 = arith.divf %621, %622 : vector<8x36xf32>
    %624 = arith.mulf %618, %623 : vector<8x36xf32>
    %c3_222 = arith.constant 3 : index
    %c0_223 = arith.constant 0 : index
    %c0_224 = arith.constant 0 : index
    %625 = vector.load %arg14[%c3_222, %c0_223, %c0_224] : memref<4x36x36xf32, #tpu.memory_space<vmem>>, vector<1x36x36xf32>
    %626 = vector.shape_cast %625 : vector<1x36x36xf32> to vector<36x36xf32>
    %cst_225 = arith.constant dense<0.000000e+00> : vector<8x36xf32>
    %627 = tpu.matmul %624, %626, %cst_225 {dimension_numbers = #tpu.dot_dimension_numbers<[1], [0], [0], [1], [0, 0, 1, 1], [], []>} : vector<8x36xf32>, vector<36x36xf32>, vector<8x36xf32> -> vector<8x36xf32>
    %c3_226 = arith.constant 3 : index
    %c0_227 = arith.constant 0 : index
    %c0_228 = arith.constant 0 : index
    %628 = vector.load %arg15[%c3_226, %c0_227, %c0_228] : memref<4x1x36xf32, #tpu.memory_space<vmem>>, vector<1x1x36xf32>
    %629 = vector.shape_cast %628 : vector<1x1x36xf32> to vector<1x36xf32>
    %630 = vector.broadcast %629 : vector<1x36xf32> to vector<8x36xf32>
    %631 = arith.addf %627, %630 : vector<8x36xf32>
    %632 = arith.negf %631 : vector<8x36xf32>
    %633 = math.exp %632 : vector<8x36xf32>
    %cst_229 = arith.constant 1.000000e+00 : f32
    %634 = vector.broadcast %cst_229 : f32 to vector<8x36xf32>
    %635 = arith.addf %634, %633 : vector<8x36xf32>
    %636 = arith.divf %634, %635 : vector<8x36xf32>
    %637 = arith.mulf %631, %636 : vector<8x36xf32>
    %c0_230 = arith.constant 0 : index
    %c0_231 = arith.constant 0 : index
    %638 = vector.load %arg16[%c0_230, %c0_231] : memref<36x4xf32, #tpu.memory_space<vmem>>, vector<36x4xf32>
    %cst_232 = arith.constant dense<0.000000e+00> : vector<8x4xf32>
    %639 = tpu.matmul %637, %638, %cst_232 {dimension_numbers = #tpu.dot_dimension_numbers<[1], [0], [0], [1], [0, 0, 1, 1], [], []>} : vector<8x36xf32>, vector<36x4xf32>, vector<8x4xf32> -> vector<8x4xf32>
    %c0_233 = arith.constant 0 : index
    %c0_234 = arith.constant 0 : index
    %640 = vector.load %arg17[%c0_233, %c0_234] : memref<1x4xf32, #tpu.memory_space<vmem>>, vector<1x4xf32>
    %641 = vector.broadcast %640 : vector<1x4xf32> to vector<8x4xf32>
    %642 = arith.addf %639, %641 : vector<8x4xf32>
    %cst_235 = arith.constant dense<0xFF800000> : vector<8xf32>
    %643 = vector.multi_reduction <maximumf>, %642, %cst_235 [1] : vector<8x4xf32> to vector<8xf32>
    %644 = vector.shape_cast %643 : vector<8xf32> to vector<8x1xf32>
    %645 = vector.broadcast %644 : vector<8x1xf32> to vector<8x4xf32>
    %646 = arith.subf %642, %645 : vector<8x4xf32>
    %647 = math.exp %646 : vector<8x4xf32>
    %cst_236 = arith.constant dense<0.000000e+00> : vector<8xf32>
    %648 = vector.multi_reduction <add>, %647, %cst_236 [1] : vector<8x4xf32> to vector<8xf32>
    %649 = vector.shape_cast %648 : vector<8xf32> to vector<8x1xf32>
    %650 = tpu.reciprocal %649 : vector<8x1xf32> -> vector<8x1xf32>
    %651 = vector.broadcast %650 : vector<8x1xf32> to vector<8x4xf32>
    %652 = arith.mulf %647, %651 : vector<8x4xf32>
    %c0_237 = arith.constant 0 : index
    %c0_238 = arith.constant 0 : index
    %653 = vector.load %arg19[%c0_237, %c0_238] : memref<8x4xf32, #tpu.memory_space<vmem>>, vector<8x4xf32>
    tpu.vector_store %arg19[%c0_237, %c0_238], %652 {strides = array<i32>} : memref<8x4xf32, #tpu.memory_space<vmem>>, vector<8x4xf32>,
    return
  }
  func.func @transform_0(%arg0: i32) -> (i32, i32, i32) {
    %c0_i32 = arith.constant 0 : i32
    %c0_i32_0 = arith.constant 0 : i32
    %c0_i32_1 = arith.constant 0 : i32
    return %c0_i32, %arg0, %c0_i32_0 : i32, i32, i32
  }
  func.func @transform_1(%arg0: i32) -> (i32, i32) {
    %c0_i32 = arith.constant 0 : i32
    %c0_i32_0 = arith.constant 0 : i32
    return %arg0, %c0_i32 : i32, i32
  }
  func.func @transform_2(%arg0: i32) -> (i32, i32) {
    %c0_i32 = arith.constant 0 : i32
    %c0_i32_0 = arith.constant 0 : i32
    %c0_i32_1 = arith.constant 0 : i32
    return %c0_i32, %c0_i32_0 : i32, i32
  }
  func.func @transform_3(%arg0: i32) -> (i32, i32) {
    %c0_i32 = arith.constant 0 : i32
    %c0_i32_0 = arith.constant 0 : i32
    %c0_i32_1 = arith.constant 0 : i32
    return %c0_i32, %c0_i32_0 : i32, i32
  }
  func.func @transform_4(%arg0: i32) -> (i32, i32) {
    %c0_i32 = arith.constant 0 : i32
    %c0_i32_0 = arith.constant 0 : i32
    %c0_i32_1 = arith.constant 0 : i32
    return %c0_i32, %c0_i32_0 : i32, i32
  }
  func.func @transform_5(%arg0: i32) -> (i32, i32) {
    %c0_i32 = arith.constant 0 : i32
    %c0_i32_0 = arith.constant 0 : i32
    %c0_i32_1 = arith.constant 0 : i32
    return %c0_i32, %c0_i32_0 : i32, i32
  }
  func.func @transform_6(%arg0: i32) -> (i32, i32, i32) {
    %c0_i32 = arith.constant 0 : i32
    %c0_i32_0 = arith.constant 0 : i32
    %c0_i32_1 = arith.constant 0 : i32
    %c0_i32_2 = arith.constant 0 : i32
    return %c0_i32, %c0_i32_0, %c0_i32_1 : i32, i32, i32
  }
  func.func @transform_7(%arg0: i32) -> (i32, i32, i32) {
    %c0_i32 = arith.constant 0 : i32
    %c0_i32_0 = arith.constant 0 : i32
    %c0_i32_1 = arith.constant 0 : i32
    %c0_i32_2 = arith.constant 0 : i32
    return %c0_i32, %c0_i32_0, %c0_i32_1 : i32, i32, i32
  }
  func.func @transform_8(%arg0: i32) -> (i32, i32, i32) {
    %c0_i32 = arith.constant 0 : i32
    %c0_i32_0 = arith.constant 0 : i32
    %c0_i32_1 = arith.constant 0 : i32
    %c0_i32_2 = arith.constant 0 : i32
    return %c0_i32, %c0_i32_0, %c0_i32_1 : i32, i32, i32
  }
  func.func @transform_9(%arg0: i32) -> (i32, i32, i32) {
    %c0_i32 = arith.constant 0 : i32
    %c0_i32_0 = arith.constant 0 : i32
    %c0_i32_1 = arith.constant 0 : i32
    %c0_i32_2 = arith.constant 0 : i32
    return %c0_i32, %c0_i32_0, %c0_i32_1 : i32, i32, i32
  }
  func.func @transform_10(%arg0: i32) -> (i32, i32, i32) {
    %c0_i32 = arith.constant 0 : i32
    %c0_i32_0 = arith.constant 0 : i32
    %c0_i32_1 = arith.constant 0 : i32
    %c0_i32_2 = arith.constant 0 : i32
    return %c0_i32, %c0_i32_0, %c0_i32_1 : i32, i32, i32
  }
  func.func @transform_11(%arg0: i32) -> (i32, i32) {
    %c0_i32 = arith.constant 0 : i32
    %c0_i32_0 = arith.constant 0 : i32
    %c0_i32_1 = arith.constant 0 : i32
    return %c0_i32, %c0_i32_0 : i32, i32
  }
  func.func @transform_12(%arg0: i32) -> (i32, i32) {
    %c0_i32 = arith.constant 0 : i32
    %c0_i32_0 = arith.constant 0 : i32
    %c0_i32_1 = arith.constant 0 : i32
    return %c0_i32, %c0_i32_0 : i32, i32
  }
  func.func @transform_13(%arg0: i32) -> (i32, i32, i32) {
    %c0_i32 = arith.constant 0 : i32
    %c0_i32_0 = arith.constant 0 : i32
    %c0_i32_1 = arith.constant 0 : i32
    %c0_i32_2 = arith.constant 0 : i32
    return %c0_i32, %c0_i32_0, %c0_i32_1 : i32, i32, i32
  }
  func.func @transform_14(%arg0: i32) -> (i32, i32, i32) {
    %c0_i32 = arith.constant 0 : i32
    %c0_i32_0 = arith.constant 0 : i32
    %c0_i32_1 = arith.constant 0 : i32
    %c0_i32_2 = arith.constant 0 : i32
    return %c0_i32, %c0_i32_0, %c0_i32_1 : i32, i32, i32
  }
  func.func @transform_15(%arg0: i32) -> (i32, i32) {
    %c0_i32 = arith.constant 0 : i32
    %c0_i32_0 = arith.constant 0 : i32
    %c0_i32_1 = arith.constant 0 : i32
    return %c0_i32, %c0_i32_0 : i32, i32
  }
  func.func @transform_16(%arg0: i32) -> (i32, i32) {
    %c0_i32 = arith.constant 0 : i32
    %c0_i32_0 = arith.constant 0 : i32
    %c0_i32_1 = arith.constant 0 : i32
    return %c0_i32, %c0_i32_0 : i32, i32
  }
  func.func @transform_17(%arg0: i32) -> (i32, i32, i32) {
    %c0_i32 = arith.constant 0 : i32
    %c0_i32_0 = arith.constant 0 : i32
    %c0_i32_1 = arith.constant 0 : i32
    return %c0_i32, %arg0, %c0_i32_0 : i32, i32, i32
  }
  func.func @transform_18(%arg0: i32) -> (i32, i32) {
    %c0_i32 = arith.constant 0 : i32
    %c0_i32_0 = arith.constant 0 : i32
    return %arg0, %c0_i32 : i32, i32
  }
}

</mosaic_0001>

<bundles_post_ra>
// kernel: tpu_custom_call.1
= control target key start
LH: loop header
LB: loop body
LE: loop exit
PB: predicated region body
PF: predicated region fallthrough
CT: control target
= control target key end

     0   :  { %s6050_s0 = inlined_call_operand.vmem [shape: f32[5,24,5], index: 0, kind: input, shape index: {}]   ;;  %s6051_s1 = inlined_call_operand.vmem [shape: f32[24,6], index: 1, kind: input, shape index: {}]   ;;  %s6052_s2 = inlined_call_operand.vmem [shape: f32[2,15], index: 2, kind: input, shape index: {}]   ;;  %s6053_s3 = inlined_call_operand.vmem [shape: f32[5,15], index: 3, kind: input, shape index: {}]   ;;  %s6054_s4 = inlined_call_operand.vmem [shape: f32[1,15], index: 4, kind: input, shape index: {}]   ;;  %s6055_s5 = inlined_call_operand.vmem [shape: f32[1,15], index: 5, kind: input, shape index: {}]   ;;  %s6056_s6 = inlined_call_operand.vmem [shape: f32[4,5,15], index: 6, kind: input, shape index: {}]   ;;  %s6057_s7 = inlined_call_operand.vmem [shape: f32[4,5,15], index: 7, kind: input, shape index: {}]   ;;  %s6058_s8 = inlined_call_operand.vmem [shape: f32[4,1,15], index: 8, kind: input, shape index: {}]   ;;  %s6059_s9 = inlined_call_operand.vmem [shape: f32[4,1,15], index: 9, kind: input, shape index: {}]   ;;  %s6060_s10 = inlined_call_operand.vmem [shape: f32[5,5,36], index: 10, kind: input, shape index: {}]   ;;  %s6061_s11 = inlined_call_operand.vmem [shape: f32[6,36], index: 11, kind: input, shape index: {}]   ;;  %s6062_s12 = inlined_call_operand.vmem [shape: f32[1,36], index: 12, kind: input, shape index: {}]   ;;  %s6063_s13 = inlined_call_operand.vmem [shape: f32[4,36,36], index: 13, kind: input, shape index: {}]   ;;  %s6064_s14 = inlined_call_operand.vmem [shape: f32[4,1,36], index: 14, kind: input, shape index: {}]   ;;  %s6065_s15 = inlined_call_operand.vmem [shape: f32[36,4], index: 15, kind: input, shape index: {}]   ;;  %s6066_s16 = inlined_call_operand.vmem [shape: f32[1,4], index: 16, kind: input, shape index: {}]   ;;  %s6067_s17 = inlined_call_operand.vmem [shape: f32[5,24,5], index: 17, kind: output, shape index: {0}]   ;;  %s6068_s18 = inlined_call_operand.vmem [shape: f32[24,4], index: 18, kind: output, shape index: {1}]  }
   0x1   :  { %6078 = sst [smem:[#allocation4_spill]] %s6050_s0 }
   0x2   :  { %6079 = sst [smem:[#allocation5_spill]] %s6051_s1 }
   0x3   :  { %6080 = sst [smem:[#allocation6_spill]] %s6052_s2 }
   0x4   :  { %6081 = sst [smem:[#allocation7_spill]] %s6053_s3 }
   0x5   :  { %6082 = sst [smem:[#allocation8_spill]] %s6054_s4 }
   0x6   :  { %s5338_s27 = smov 0   ;;  %s5340_s28 = smov 0  }
   0x7   :  { %s5342_s29 = smov 0  }
   0x8 LB: > { %s5354_s30 = sadd.s32 4294967295, %s5233_s29   ;;  %s5357_s0 = sadd.s32 1, %s5233_s29   ;;  %s5233_s29 = sphi %s5342_s29, %s6096_s29   ;;  %s5229_s28 = sphi %s5340_s28, %s6095_s28   ;;  %s5225_s27 = sphi %s5338_s27, %s6094_s27  }
   0x9   : > { %s33_s19 = ssub.s32 %s5233_s29, %s5357_s0  ;;  %s36_s1 = sadd.s32 1, %s5229_s28 }
   0xa   : > { %p34_p0 = scmp.eq.s32.totalorder %s33_s19, 0  ;;  %p43_p1 = scmp.ne.s32.totalorder %s5229_s28, %s5225_s27 }
   0xb   : > { %p44_p2 = scmp.eq.s32.totalorder %s5233_s29, 0  ;;  %p414_p3 = scmp.eq.s32.totalorder %s5354_s30, 2 }
   0xc   : > { %s5367_s20 = scalar_select %p34_p0, %s5229_s28, %s36_s1  }
   0xd   : > { %p45_p4 = por %p44_p2, %p43_p1  ;;  %p5369_p5 = por %p414_p3, %p43_p1 }
   0xe   : > { %p4543_p6 = scmp.ge.s32.totalorder %s5233_s29, 3 }
  0x10   : > { %507 = sbr.rel (%p4543_p6) target bundleno = 34 (0x22), region = 76 }
  0x15   : > { %510 = sbr.rel (!%p45_p4) target bundleno = 34 (0x22), region = 80  ;;  %s512_s22 = sand.u32 (%p45_p4), 1, %s5229_s28  }
  0x16   : > { %s4544_s2 = sshll.u32 (%p45_p4), %s5233_s29, 3  ;;  %s5062_s23 = smul.u32 (%p45_p4), 40, %s512_s22 }
  0x17   : > { %s6084_s26 = sld [smem:[#allocation4_spill]] (%p45_p4) }
  0x18   : > { %s514_s1 = scalar_lea.vmem (%p45_p4), [#allocation2], %s5062_s23 }
  0x1d   : > { %s516_s19 = scalar_lea.vmem %s6084_s26, %s4544_s2 }
  0x1e   : > { %v553_v0 = vld [vmem:[%s516_s19] sm:$0xff]  ;;  %v555_v1 = vld [vmem:[%s516_s19 + $0x18] sm:$0xff]  ;;  %v557_v2 = vld [vmem:[%s516_s19 + $0x30] sm:$0xff] }
  0x1f   : > { %v559_v3 = vld [vmem:[%s516_s19 + $0x48] sm:$0xff]  ;;  %v561_v4 = vld [vmem:[%s516_s19 + $0x60] sm:$0xff]  ;;  %554 = vst [vmem:[%s514_s1] sm:$0xff] %v553_v0  ;;  %556 = vst [vmem:[%s514_s1 + $0x8] sm:$0xff] %v555_v1 }
  0x20   : > { %558 = vst [vmem:[%s514_s1 + $0x10] sm:$0xff] %v557_v2  ;;  %560 = vst [vmem:[%s514_s1 + $0x18] sm:$0xff] %v559_v3 }
  0x21   : > { %562 = vst [vmem:[%s514_s1 + $0x20] sm:$0xff] %v561_v4 }
  0x22 PF: > { %p4545_p7 = scmp.ge.s32.totalorder %s5233_s29, 1  ;;  %p574_p8 = scmp.lt.s32.totalorder %s5233_s29, 4 }
  0x24   : > { %p575_p9 = pnand %p4545_p7, %p574_p8 }
  0x25   : > { %s6085_s24 = sld [smem:[#allocation6_spill]] (!%p575_p9)  ;;  %p641_p10 = scmp.lt.s32.totalorder (!%p575_p9), %s5354_s30, 2 }
  0x26   : > { %578 = sbr.rel (%p575_p9) target bundleno = 8509 (0x213d), region = 122  ;;  %s581_s29 = sand.u32 (!%p575_p9), 1, %s5225_s27  }
  0x27   : > { %s5398_s25 = smul.u32 (!%p575_p9), 40, %s581_s29  ;;  %s6086_s1 = sld [smem:[#allocation5_spill]] (!%p575_p9) }
  0x28   : > { %s6087_s3 = sld [smem:[#allocation7_spill]] (!%p575_p9)  ;;  %s6076_s27 = smov (!%p575_p9), 10  }
  0x29   : > { %s5425_s29 = scalar_lea.vmem (!%p575_p9), [#allocation2], %s5398_s25  ;;  %s6088_s4 = sld [smem:[#allocation8_spill]] (!%p575_p9) }
  0x2a   : > { %s6072_s19 = smov (!%p575_p9), 123   ;;  %s6070_s2 = smov (!%p575_p9), 5  }
  0x2b   : > { %v5384_v5 = vld [vmem:[%s6085_s24] sm:$0x3]  ;;  %vm665_vm0 = vcmask 1041408   ;;  %v5235_v6 = vmov 0.0   ;;  %vm5236_vm1 = vmmov 0   ;;  %s5394_s23 = scalar_select %p641_p10, %s5354_s30, 2 }
  0x2c   : > { %4817 = vmatprep.subr.mxu1 %v5235_v6  ;;  %4819 = vmatprep.mubr.msk.f32.mxu1 %vm5236_vm1, %v5235_v6  ;;  %vm661_vm2 = vcmask 15360   ;;  %vm749_vm3 = vcmask 1044480   ;;  %v654_v9 = vld [vmem:[%s5425_s29] sm:$0xff]  ;;  %vm745_vm4 = vcmask 39936   ;;  %s5241_s24 = smov 126   ;;  %v5498_v61 = vld [vmem:[%s5425_s29 + $0x8] sm:$0xff] }
  0x2d   : > { %4818 = vmatpush3.msk.msra.mxu1 %vm665_vm0, %v5384_v5  ;;  %4827 = vmatprep.subr.mxu0 %v5235_v6  ;;  %s6069_s26 = sshll.u32 %s5394_s23, 3  ;;  %v5437_v12 = vld [vmem:[%s6055_s5] ss:$0 sm:$0xff]  ;;  %vm3485_vm5 = vcmask 1045504   ;;  %vm3482_vm6 = vcmask 48128   ;;  %vm3910_vm7 = vcmask 1043456  }
  0x2e   : > { %4822 = vmatprep.subr.mxu1 %v5235_v6  ;;  %4828 = vmatpush3.msk.msra.mxu0 %vm665_vm0, %v5384_v5  ;;  %s5411_s22 = scalar_lea.vmem %s6086_s1, %s6069_s26  ;;  %v651_v7 = vld [vmem:[%s6087_s3] sm:$0x1f]  ;;  %s6074_s1 = smov 118   ;;  %vm3906_vm8 = vcmask 293888   ;;  %vm4370_vm9 = vcmask 31744  }
  0x2f   : > { %4829 = vmatprep.mubr.msk.f32.mxu0 %vm5236_vm1, %v5235_v6  ;;  %4837 = vmatprep.subr.mxu0 %v5235_v6  ;;  %v5417_v8 = vld [vmem:[%s5411_s22] sm:$0xff]  ;;  %s6091_s26 = smov 118  }
  0x30   : > { %4820 = vmatmul.mubr.msk.f32.vlgmr.msra.gmra.mxu1 %vm661_vm2, %v5417_v8  ;;  %v5444_v16 = vld [vmem:[%s6088_s4] ss:$0 sm:$0xff]  ;;  %s6093_s4 = sshll.u32 %s5394_s23, 3 }
  0x31   : > { %4823 = vmatpush3.msk.msra.mxu1 %vm749_vm3, %v651_v7  ;;  %4824 = vmatprep.mubr.msk.f32.mxu1 %vm5236_vm1, %v5235_v6  ;;  %v1207_v57 = vld [vmem:[%s6056_s6] sm:$0x1f] }
  0x32   : > { %4832 = vmatprep.subr.mxu1 %v5235_v6  ;;  %v5489_v59 = vld [vmem:[%s6057_s7] sm:$0x1f] }
  0x34   : > { %4825 = vmatmul.mubr.msk.f32.vlgmr.msra.gmra.mxu1 %vm745_vm4, %v654_v9 }
  0x35   : > { %4833 = vmatpush3.msk.msra.mxu1 %vm749_vm3, %v651_v7  ;;  %4834 = vmatprep.mubr.msk.f32.mxu1 %vm5236_vm1, %v5235_v6 }
  0x36   : > { %4842 = vmatprep.subr.mxu1 %v5235_v6 }
  0xf0   : > { %v735_v10 = vpop.f32.mrf.mxu1 }
  0xf1   : > { %v736_v17 = vadd.f32 %v5444_v16, %v735_v10 }
  0xf2   : > { %v4821_v11 = vpop.f32.mrf.mxu1 }
  0xf3   : > { %v5524_v11 = vld [vmem:[%s6058_s8] ss:$0 sm:$0xff] }
  0xf4   : > { %v819_v13 = vpop.f32.mrf.mxu1 }
  0xf5   : > { %v820_v14 = vadd.f32 %v5437_v12, %v819_v13 }
  0xf6   : > { %v4826_v15 = vpop.f32.mrf.mxu1 }
  0xf7   : > { %831 = vrot.lane.b32.xlu0 %v820_v14, %s6074_s1  ;;  %v823_v18 = vadd.f32 %v820_v14, %v736_v17 }
  0xf9   : > { %v4554_v19 = vmul.f32 -1.442695, %v823_v18 }
  0xfb   : > { %5096 = vpow2.f32 %v4554_v19 }
 0x108   : > { %v5097_v20 = vpop.eup %5096 }
 0x109   : > { %v827_v21 = vadd.f32 1.0, %v5097_v20 }
 0x10b   : > { %5098 = vrcp.f32 %v827_v21 }
 0x118   : > { %v5099_v22 = vpop.eup %5098 }
 0x119   : > { %v841_v29 = vsub.f32 1.0, %v5099_v22 }
 0x169   : > { %v832_v23 = vpop.permute.xlu0 %831 }
 0x16a   : > { %v834_v24 = vmul.f32 %v5099_v22, %v832_v23 }
 0x16c   : > { %836 = vrot.lane.b32.xlu0 %v834_v24, %s6076_s27 }
 0x1de   : > { %v837_v25 = vpop.permute.xlu0 %836 }
 0x1df   : > { %v839_v26 = vadd.f32 %v837_v25, %v736_v17 }
 0x1e1   : > { %5100 = vtanh.f32 %v839_v26 }
 0x1ee   : > { %v5101_v27 = vpop.eup %5100 }
 0x1ef   : > { %843 = vrot.lane.b32.xlu1 %v5101_v27, %s6072_s19 }
 0x1f3   : > { %847 = vrot.lane.b32.xlu1 %v654_v9, %s6070_s2  ;;  %s6092_s2 = smov 10  }
 0x1f7   : > { %852 = vrot.lane.b32.xlu1 %v5417_v8, %s5241_s24  ;;  %s5242_s24 = smov 124  }
 0x261   : > { %v844_v28 = vpop.permute.xlu1 %843 }
 0x262   : > { %v846_v31 = vmul.f32 %v844_v28, %v841_v29 }
 0x265   : > { %v848_v30 = vpop.permute.xlu1 %847 }
 0x266   : > { %v850_v32 = vmul.f32 %v5099_v22, %v848_v30 }
 0x268   : > { %v851_v33 = vadd.f32 %v850_v32, %v846_v31 }
 0x269   : > { %v853_v34 = vpop.permute.xlu1 %852 }
 0x26a   : > { %927 = vrot.lane.b32.xlu0 %v851_v33, %s6072_s19  ;;  %4830 = vmatmul.mubr.msk.f32.vlgmr.msra.gmra.mxu0 %vm661_vm2, %v853_v34 }
 0x26b   : > { %4838 = vmatpush3.msk.msra.mxu0 %vm665_vm0, %v5384_v5  ;;  %4839 = vmatprep.mubr.msk.f32.mxu0 %vm5236_vm1, %v5235_v6 }
 0x26c   : > { %4847 = vmatprep.subr.mxu0 %v5235_v6 }
 0x2dc   : > { %v928_v35 = vpop.permute.xlu0 %927 }
 0x2dd   : > { %4835 = vmatmul.mubr.msk.f32.vlgmr.msra.gmra.mxu1 %vm745_vm4, %v928_v35 }
 0x2de   : > { %4843 = vmatpush3.msk.msra.mxu1 %vm749_vm3, %v651_v7  ;;  %4844 = vmatprep.mubr.msk.f32.mxu1 %vm5236_vm1, %v5235_v6  ;;  %v5517_v7 = vld [vmem:[%s6059_s9] ss:$0 sm:$0xff] }
 0x2df   : > { %4852 = vmatprep.subr.mxu1 %v5235_v6 }
 0x32a   : > { %v922_v36 = vpop.f32.mrf.mxu0 }
 0x32b   : > { %v923_v41 = vadd.f32 %v5444_v16, %v922_v36 }
 0x32c   : > { %v4831_v37 = vpop.f32.mrf.mxu0 }
 0x39d   : > { %v997_v38 = vpop.f32.mrf.mxu1 }
 0x39e   : > { %v998_v39 = vadd.f32 %v5437_v12, %v997_v38 }
 0x39f   : > { %v4836_v40 = vpop.f32.mrf.mxu1 }
 0x3a0   : > { %1009 = vrot.lane.b32.xlu0 %v998_v39, %s6074_s1  ;;  %v1001_v42 = vadd.f32 %v998_v39, %v923_v41 }
 0x3a2   : > { %v4559_v43 = vmul.f32 -1.442695, %v1001_v42 }
 0x3a4   : > { %5102 = vpow2.f32 %v4559_v43 }
 0x3b1   : > { %v5103_v44 = vpop.eup %5102 }
 0x3b2   : > { %v1005_v45 = vadd.f32 1.0, %v5103_v44 }
 0x3b4   : > { %5104 = vrcp.f32 %v1005_v45 }
 0x3c1   : > { %v5105_v46 = vpop.eup %5104 }
 0x3c2   : > { %v1019_v52 = vsub.f32 1.0, %v5105_v46  ;;  %v1025_v54 = vmul.f32 %v5105_v46, %v851_v33 }
 0x412   : > { %v1010_v47 = vpop.permute.xlu0 %1009 }
 0x413   : > { %v1012_v48 = vmul.f32 %v5105_v46, %v1010_v47 }
 0x415   : > { %1014 = vrot.lane.b32.xlu1 %v1012_v48, %s6076_s27 }
 0x487   : > { %v1015_v49 = vpop.permute.xlu1 %1014 }
 0x488   : > { %v1017_v50 = vadd.f32 %v1015_v49, %v923_v41 }
 0x48a   : > { %5106 = vtanh.f32 %v1017_v50 }
 0x497   : > { %v5107_v51 = vpop.eup %5106 }
 0x498   : > { %1021 = vrot.lane.b32.xlu0 %v5107_v51, %s6072_s19 }
 0x49c   : > { %1027 = vrot.lane.b32.xlu0 %v5417_v8, %s5242_s24  ;;  %s6089_s24 = smov 5  }
 0x50a   : > { %v1022_v53 = vpop.permute.xlu0 %1021 }
 0x50b   : > { %v1024_v55 = vmul.f32 %v1022_v53, %v1019_v52 }
 0x50d   : > { %v5469_v56 = vadd.f32 %v1025_v54, %v1024_v55 }
 0x50e   : > { %v1028_v58 = vpop.permute.xlu0 %1027 }
 0x50f   : > { %1102 = vrot.lane.b32.xlu1 %v5469_v56, %s6072_s19  ;;  %4840 = vmatmul.mubr.msk.f32.vlgmr.msra.gmra.mxu0 %vm661_vm2, %v1028_v58  ;;  %s6090_s19 = smov 123  }
 0x510   : > { %4848 = vmatpush3.msk.msra.mxu0 %vm749_vm3, %v1207_v57  ;;  %4849 = vmatprep.mubr.msk.f32.mxu0 %vm5236_vm1, %v5235_v6 }
 0x511   : > { %4857 = vmatprep.subr.mxu0 %v5235_v6 }
 0x513   : > { %4850 = vmatmul.mubr.msk.f32.vlgmr.msra.gmra.mxu0 %vm745_vm4, %v928_v35 }
 0x514   : > { %4858 = vmatpush3.msk.msra.mxu0 %vm749_vm3, %v1207_v57  ;;  %4859 = vmatprep.mubr.msk.f32.mxu0 %vm5236_vm1, %v5235_v6 }
 0x515   : > { %4867 = vmatprep.subr.mxu0 %v5235_v6 }
 0x581   : > { %v1103_v60 = vpop.permute.xlu1 %1102 }
 0x582   : > { %4845 = vmatmul.mubr.msk.f32.vlgmr.msra.gmra.mxu1 %vm745_vm4, %v1103_v60  ;;  %4860 = vmatmul.mubr.msk.f32.vlgmr.msra.gmra.mxu0 %vm745_vm4, %v1103_v60 }
 0x583   : > { %4853 = vmatpush3.msk.msra.mxu1 %vm749_vm3, %v5489_v59  ;;  %4854 = vmatprep.mubr.msk.f32.mxu1 %vm5236_vm1, %v5235_v6 }
 0x584   : > { %4862 = vmatprep.subr.mxu1 %v5235_v6  ;;  %4868 = vmatpush3.msk.msra.mxu0 %vm749_vm3, %v1207_v57 }
 0x585   : > { %4869 = vmatprep.mubr.msk.f32.mxu0 %vm5236_vm1, %v5235_v6  ;;  %4877 = vmatprep.subr.mxu0 %v5235_v6 }
 0x586   : > { %4855 = vmatmul.mubr.msk.f32.vlgmr.msra.gmra.mxu1 %vm745_vm4, %v5498_v61 }
 0x587   : > { %4863 = vmatpush3.msk.msra.mxu1 %vm749_vm3, %v5489_v59  ;;  %4864 = vmatprep.mubr.msk.f32.mxu1 %vm5236_vm1, %v5235_v6 }
 0x588   : > { %4872 = vmatprep.subr.mxu1 %v5235_v6 }
 0x5cf   : > { %v1097_v62 = vpop.f32.mrf.mxu0 }
 0x5d0   : > { %v1098_v32 = vadd.f32 %v5444_v16, %v1097_v62 }
 0x5d1   : > { %v4841_v63 = vpop.f32.mrf.mxu0 }
 0x5d3   : > { %v1288_v0 = vpop.f32.mrf.mxu0 }
 0x5d4   : > { %v1289_v13 = vadd.f32 %v5524_v11, %v1288_v0 }
 0x5d5   : > { %v4851_v1 = vpop.f32.mrf.mxu0 }
 0x642   : > { %v1172_v2 = vpop.f32.mrf.mxu1  ;;  %v5512_v3 = vpop.f32.mrf.mxu0 }
 0x643   : > { %v1173_v31 = vadd.f32 %v5437_v12, %v1172_v2  ;;  %v1470_v50 = vadd.f32 %v5524_v11, %v5512_v3 }
 0x644   : > { %v4846_v4 = vpop.f32.mrf.mxu1  ;;  %v4861_v5 = vpop.f32.mrf.mxu0 }
 0x645   : > { %v1176_v33 = vadd.f32 %v1173_v31, %v1098_v32 }
 0x646   : > { %v1370_v8 = vpop.f32.mrf.mxu1 }
 0x647   : > { %v1371_v9 = vadd.f32 %v5517_v7, %v1370_v8  ;;  %v4564_v34 = vmul.f32 -1.442695, %v1176_v33 }
 0x648   : > { %v4856_v10 = vpop.f32.mrf.mxu1 }
 0x649   : > { %1382 = vrot.lane.b32.xlu1 %v1371_v9, %s6074_s1  ;;  %v1374_v14 = vadd.f32 %v1371_v9, %v1289_v13 }
 0x64b   : > { %v4572_v15 = vmul.f32 -1.442695, %v1374_v14 }
 0x64d   : > { %5108 = vpow2.f32 %v4572_v15  ;;  %v5586_v15 = vld [vmem:[%s5425_s29 + $0x10] sm:$0xff] }
 0x65a   : > { %v5109_v17 = vpop.eup %5108 }
 0x65b   : > { %v1378_v18 = vadd.f32 1.0, %v5109_v17 }
 0x65d   : > { %5110 = vrcp.f32 %v1378_v18 }
 0x66a   : > { %v5111_v19 = vpop.eup %5110 }
 0x66b   : > { %v1392_v26 = vsub.f32 1.0, %v5111_v19 }
 0x6bb   : > { %v1383_v20 = vpop.permute.xlu1 %1382 }
 0x6bc   : > { %v1385_v21 = vmul.f32 %v5111_v19, %v1383_v20 }
 0x6be   : > { %1387 = vrot.lane.b32.xlu0 %v1385_v21, %s6076_s27  ;;  %v5604_v21 = vld [vmem:[%s6059_s9 + $0x1] ss:$0 sm:$0xff] }
 0x6c2   : > { %1398 = vrot.lane.b32.xlu0 %v5498_v61, %s6089_s24 }
 0x730   : > { %v1388_v22 = vpop.permute.xlu0 %1387 }
 0x731   : > { %v1390_v23 = vadd.f32 %v1388_v22, %v1289_v13  ;;  %v4585_v13 = vld [vmem:[%s6057_s7 + $0x8] sm:$0x1f] }
 0x733   : > { %5112 = vtanh.f32 %v1390_v23 }
 0x734   : > { %v1399_v25 = vpop.permute.xlu0 %1398  ;;  %5114 = vpow2.f32 %v4564_v34 }
 0x735   : > { %v1401_v28 = vmul.f32 %v5111_v19, %v1399_v25  ;;  %v5611_v25 = vld [vmem:[%s6058_s8 + $0x1] ss:$0 sm:$0xff] }
 0x740   : > { %v5113_v24 = vpop.eup %5112 }
 0x741   : > { %1394 = vrot.lane.b32.xlu1 %v5113_v24, %s6090_s19  ;;  %v5115_v35 = vpop.eup %5114 }
 0x742   : > { %v1180_v36 = vadd.f32 1.0, %v5115_v35 }
 0x744   : > { %5116 = vrcp.f32 %v1180_v36 }
 0x751   : > { %v5117_v12 = vpop.eup %5116 }
 0x752   : > { %v1194_v45 = vsub.f32 1.0, %v5117_v12  ;;  %v1200_v47 = vmul.f32 %v5117_v12, %v5469_v56  ;;  %v4584_v56 = vld [vmem:[%s6056_s6 + $0x8] sm:$0x1f] }
 0x7b3   : > { %v1395_v27 = vpop.permute.xlu1 %1394 }
 0x7b4   : > { %v1397_v29 = vmul.f32 %v1395_v27, %v1392_v26 }
 0x7b6   : > { %v5531_v30 = vadd.f32 %v1401_v28, %v1397_v29 }
 0x7b8   : > { %1474 = vrot.lane.b32.xlu1 %v5531_v30, %s6090_s19 }
 0x7bc   : > { %1184 = vrot.lane.b32.xlu1 %v1173_v31, %s6074_s1 }
 0x82a   : > { %v1475_v37 = vpop.permute.xlu1 %1474 }
 0x82b   : > { %4865 = vmatmul.mubr.msk.f32.vlgmr.msra.gmra.mxu1 %vm745_vm4, %v1475_v37 }
 0x82c   : > { %4873 = vmatpush3.msk.msra.mxu1 %vm749_vm3, %v5489_v59  ;;  %4874 = vmatprep.mubr.msk.f32.mxu1 %vm5236_vm1, %v5235_v6 }
 0x82d   : > { %4882 = vmatprep.subr.mxu1 %v5235_v6 }
 0x82e   : > { %v1185_v38 = vpop.permute.xlu1 %1184 }
 0x82f   : > { %v1187_v16 = vmul.f32 %v5117_v12, %v1185_v38 }
 0x831   : > { %1189 = vrot.lane.b32.xlu1 %v1187_v16, %s6076_s27 }
 0x8a3   : > { %v1190_v39 = vpop.permute.xlu1 %1189 }
 0x8a4   : > { %v1192_v40 = vadd.f32 %v1190_v39, %v1098_v32 }
 0x8a6   : > { %5118 = vtanh.f32 %v1192_v40 }
 0x8b3   : > { %v5119_v41 = vpop.eup %5118 }
 0x8b4   : > { %1196 = vrot.lane.b32.xlu1 %v5119_v41, %s6090_s19 }
 0x8eb   : > { %v1544_v42 = vpop.f32.mrf.mxu1 }
 0x8ec   : > { %v1545_v43 = vadd.f32 %v5517_v7, %v1544_v42 }
 0x8ed   : > { %v4866_v44 = vpop.f32.mrf.mxu1 }
 0x8ee   : > { %1556 = vrot.lane.b32.xlu0 %v1545_v43, %s6074_s1  ;;  %v1548_v51 = vadd.f32 %v1545_v43, %v1470_v50  ;;  %s5557_s1 = scalar_lea.vmem [#allocation3], %s5398_s25  ;;  %s648_s25 = scalar_lea.vmem %s6068_s18, %s6093_s4 }
 0x8f0   : > { %v4577_v52 = vmul.f32 -1.442695, %v1548_v51 }
 0x8f2   : > { %5120 = vpow2.f32 %v4577_v52 }
 0x8ff   : > { %v5121_v53 = vpop.eup %5120 }
 0x900   : > { %v1552_v54 = vadd.f32 1.0, %v5121_v53 }
 0x902   : > { %5122 = vrcp.f32 %v1552_v54 }
 0x90f   : > { %v5123_v55 = vpop.eup %5122 }
 0x910   : > { %v1566_v0 = vsub.f32 1.0, %v5123_v55  ;;  %v1572_v2 = vmul.f32 %v5123_v55, %v5531_v30 }
 0x926   : > { %v1197_v46 = vpop.permute.xlu1 %1196 }
 0x927   : > { %v1199_v48 = vmul.f32 %v1197_v46, %v1194_v45 }
 0x929   : > { %v1201_v49 = vadd.f32 %v1200_v47, %v1199_v48 }
 0x92b   : > { %1203 = vrot.lane.b32.xlu1 %v1201_v49, %s6090_s19 }
 0x960   : > { %v1557_v57 = vpop.permute.xlu0 %1556 }
 0x961   : > { %v1559_v58 = vmul.f32 %v5123_v55, %v1557_v57 }
 0x963   : > { %1561 = vrot.lane.b32.xlu0 %v1559_v58, %s6076_s27 }
 0x99d   : > { %v1204_v59 = vpop.permute.xlu1 %1203 }
 0x99e   : > { %1206 = vst.msk [vmem:[%s5557_s1] sm:$0xff] %vm745_vm4, %v1204_v59  ;;  %4870 = vmatmul.mubr.msk.f32.vlgmr.msra.gmra.mxu0 %vm745_vm4, %v1204_v59 }
 0x99f   : > { %4878 = vmatpush3.msk.msra.mxu0 %vm749_vm3, %v4584_v56  ;;  %4879 = vmatprep.mubr.msk.f32.mxu0 %vm5236_vm1, %v5235_v6 }
 0x9a0   : > { %4887 = vmatprep.subr.mxu0 %v5235_v6 }
 0x9a2   : > { %4880 = vmatmul.mubr.msk.f32.vlgmr.msra.gmra.mxu0 %vm745_vm4, %v1475_v37 }
 0x9a3   : > { %4888 = vmatpush3.msk.msra.mxu0 %vm749_vm3, %v4584_v56  ;;  %4889 = vmatprep.mubr.msk.f32.mxu0 %vm5236_vm1, %v5235_v6 }
 0x9a4   : > { %4897 = vmatprep.subr.mxu0 %v5235_v6 }
 0x9d5   : > { %v1562_v60 = vpop.permute.xlu0 %1561 }
 0x9d6   : > { %v1564_v62 = vadd.f32 %v1562_v60, %v1470_v50 }
 0x9d8   : > { %5124 = vtanh.f32 %v1564_v62 }
 0x9e5   : > { %v5125_v63 = vpop.eup %5124 }
 0x9e6   : > { %1568 = vrot.lane.b32.xlu0 %v5125_v63, %s6090_s19 }
 0xa58   : > { %v1569_v1 = vpop.permute.xlu0 %1568 }
 0xa59   : > { %v1571_v3 = vmul.f32 %v1569_v1, %v1566_v0 }
 0xa5b   : > { %v5573_v4 = vadd.f32 %v1572_v2, %v1571_v3 }
 0xa5d   : > { %1647 = vrot.lane.b32.xlu0 %v5573_v4, %s6090_s19 }
 0xa5e   : > { %v1642_v5 = vpop.f32.mrf.mxu0 }
 0xa5f   : > { %v1643_v42 = vadd.f32 %v5524_v11, %v1642_v5 }
 0xa60   : > { %v4871_v8 = vpop.f32.mrf.mxu0 }
 0xa62   : > { %v1838_v9 = vpop.f32.mrf.mxu0 }
 0xa63   : > { %v1839_v26 = vadd.f32 %v5611_v25, %v1838_v9 }
 0xa64   : > { %v4881_v10 = vpop.f32.mrf.mxu0 }
 0xacf   : > { %v1648_v14 = vpop.permute.xlu0 %1647 }
 0xad0   : > { %4875 = vmatmul.mubr.msk.f32.vlgmr.msra.gmra.mxu1 %vm745_vm4, %v1648_v14  ;;  %4890 = vmatmul.mubr.msk.f32.vlgmr.msra.gmra.mxu0 %vm745_vm4, %v1648_v14 }
 0xad1   : > { %4883 = vmatpush3.msk.msra.mxu1 %vm749_vm3, %v4585_v13  ;;  %4884 = vmatprep.mubr.msk.f32.mxu1 %vm5236_vm1, %v5235_v6 }
 0xad2   : > { %4892 = vmatprep.subr.mxu1 %v5235_v6  ;;  %4898 = vmatpush3.msk.msra.mxu0 %vm749_vm3, %v4584_v56 }
 0xad3   : > { %4899 = vmatprep.mubr.msk.f32.mxu0 %vm5236_vm1, %v5235_v6  ;;  %4907 = vmatprep.subr.mxu0 %v5235_v6 }
 0xad4   : > { %4885 = vmatmul.mubr.msk.f32.vlgmr.msra.gmra.mxu1 %vm745_vm4, %v5586_v15 }
 0xad5   : > { %4893 = vmatpush3.msk.msra.mxu1 %vm749_vm3, %v4585_v13  ;;  %4894 = vmatprep.mubr.msk.f32.mxu1 %vm5236_vm1, %v5235_v6 }
 0xad6   : > { %4902 = vmatprep.subr.mxu1 %v5235_v6 }
 0xb90   : > { %v1717_v17 = vpop.f32.mrf.mxu1  ;;  %v5599_v18 = vpop.f32.mrf.mxu0 }
 0xb91   : > { %v1718_v41 = vadd.f32 %v5517_v7, %v1717_v17  ;;  %v2020_v60 = vadd.f32 %v5611_v25, %v5599_v18 }
 0xb92   : > { %v4876_v19 = vpop.f32.mrf.mxu1  ;;  %v4891_v20 = vpop.f32.mrf.mxu0 }
 0xb93   : > { %v1721_v43 = vadd.f32 %v1718_v41, %v1643_v42 }
 0xb94   : > { %v1920_v22 = vpop.f32.mrf.mxu1 }
 0xb95   : > { %v1921_v23 = vadd.f32 %v5604_v21, %v1920_v22  ;;  %v4582_v44 = vmul.f32 -1.442695, %v1721_v43 }
 0xb96   : > { %v4886_v24 = vpop.f32.mrf.mxu1 }
 0xb97   : > { %1932 = vrot.lane.b32.xlu0 %v1921_v23, %s6091_s26  ;;  %v1924_v27 = vadd.f32 %v1921_v23, %v1839_v26 }
 0xb99   : > { %v4595_v28 = vmul.f32 -1.442695, %v1924_v27  ;;  %v4608_v27 = vld [vmem:[%s6057_s7 + $0x10] sm:$0x1f] }
 0xb9b   : > { %5126 = vpow2.f32 %v4595_v28 }
 0xba8   : > { %v5127_v29 = vpop.eup %5126 }
 0xba9   : > { %v1928_v30 = vadd.f32 1.0, %v5127_v29  ;;  %v5669_v29 = vld [vmem:[%s5425_s29 + $0x18] sm:$0xff] }
 0xbab   : > { %5128 = vrcp.f32 %v1928_v30 }
 0xbb8   : > { %v5129_v31 = vpop.eup %5128 }
 0xbb9   : > { %v1942_v12 = vsub.f32 1.0, %v5129_v31 }
 0xc09   : > { %v1933_v32 = vpop.permute.xlu0 %1932 }
 0xc0a   : > { %v1935_v33 = vmul.f32 %v5129_v31, %v1933_v32 }
 0xc0c   : > { %1937 = vrot.lane.b32.xlu1 %v1935_v33, %s6092_s2 }
 0xc10   : > { %1948 = vrot.lane.b32.xlu1 %v5586_v15, %s6089_s24 }
 0xc7e   : > { %v1938_v34 = vpop.permute.xlu1 %1937 }
 0xc7f   : > { %v1940_v35 = vadd.f32 %v1938_v34, %v1839_v26  ;;  %v5687_v34 = vld [vmem:[%s6059_s9 + $0x2] ss:$0 sm:$0xff] }
 0xc81   : > { %5130 = vtanh.f32 %v1940_v35 }
 0xc82   : > { %v1949_v37 = vpop.permute.xlu1 %1948  ;;  %5132 = vpow2.f32 %v4582_v44 }
 0xc83   : > { %v1951_v16 = vmul.f32 %v5129_v31, %v1949_v37 }
 0xc8e   : > { %v5131_v36 = vpop.eup %5130 }
 0xc8f   : > { %1944 = vrot.lane.b32.xlu0 %v5131_v36, %s6090_s19  ;;  %v5133_v45 = vpop.eup %5132 }
 0xc90   : > { %v1725_v46 = vadd.f32 1.0, %v5133_v45 }
 0xc92   : > { %5134 = vrcp.f32 %v1725_v46 }
 0xc9f   : > { %v5135_v7 = vpop.eup %5134 }
 0xca0   : > { %v1739_v55 = vsub.f32 1.0, %v5135_v7  ;;  %v1745_v58 = vmul.f32 %v5135_v7, %v5573_v4  ;;  %v4607_v4 = vld [vmem:[%s6056_s6 + $0x10] sm:$0x1f] }
 0xd01   : > { %v1945_v38 = vpop.permute.xlu0 %1944 }
 0xd02   : > { %v1947_v39 = vmul.f32 %v1945_v38, %v1942_v12  ;;  %v5694_v12 = vld [vmem:[%s6058_s8 + $0x2] ss:$0 sm:$0xff] }
 0xd04   : > { %v5618_v40 = vadd.f32 %v1951_v16, %v1947_v39 }
 0xd06   : > { %2024 = vrot.lane.b32.xlu0 %v5618_v40, %s6090_s19 }
 0xd0a   : > { %1729 = vrot.lane.b32.xlu0 %v1718_v41, %s6091_s26 }
 0xd78   : > { %v2025_v47 = vpop.permute.xlu0 %2024 }
 0xd79   : > { %4895 = vmatmul.mubr.msk.f32.vlgmr.msra.gmra.mxu1 %vm745_vm4, %v2025_v47 }
 0xd7a   : > { %4903 = vmatpush3.msk.msra.mxu1 %vm749_vm3, %v4585_v13  ;;  %4904 = vmatprep.mubr.msk.f32.mxu1 %vm5236_vm1, %v5235_v6 }
 0xd7b   : > { %4912 = vmatprep.subr.mxu1 %v5235_v6 }
 0xd7c   : > { %v1730_v48 = vpop.permute.xlu0 %1729 }
 0xd7d   : > { %v1732_v49 = vmul.f32 %v5135_v7, %v1730_v48 }
 0xd7f   : > { %1734 = vrot.lane.b32.xlu0 %v1732_v49, %s6092_s2 }
 0xdf1   : > { %v1735_v11 = vpop.permute.xlu0 %1734 }
 0xdf2   : > { %v1737_v50 = vadd.f32 %v1735_v11, %v1643_v42 }
 0xdf4   : > { %5136 = vtanh.f32 %v1737_v50 }
 0xe01   : > { %v5137_v51 = vpop.eup %5136 }
 0xe02   : > { %1741 = vrot.lane.b32.xlu0 %v5137_v51, %s6090_s19 }
 0xe39   : > { %v2094_v52 = vpop.f32.mrf.mxu1 }
 0xe3a   : > { %v2095_v53 = vadd.f32 %v5604_v21, %v2094_v52 }
 0xe3b   : > { %v4896_v54 = vpop.f32.mrf.mxu1 }
 0xe3c   : > { %2106 = vrot.lane.b32.xlu1 %v2095_v53, %s6091_s26  ;;  %v2098_v62 = vadd.f32 %v2095_v53, %v2020_v60 }
 0xe3e   : > { %v4600_v63 = vmul.f32 -1.442695, %v2098_v62 }
 0xe40   : > { %5138 = vpow2.f32 %v4600_v63 }
 0xe4d   : > { %v5139_v0 = vpop.eup %5138 }
 0xe4e   : > { %v2102_v1 = vadd.f32 1.0, %v5139_v0 }
 0xe50   : > { %5140 = vrcp.f32 %v2102_v1 }
 0xe5d   : > { %v5141_v2 = vpop.eup %5140 }
 0xe5e   : > { %v2116_v14 = vsub.f32 1.0, %v5141_v2  ;;  %v2122_v18 = vmul.f32 %v5141_v2, %v5618_v40 }
 0xe74   : > { %v1742_v57 = vpop.permute.xlu0 %1741 }
 0xe75   : > { %v1744_v56 = vmul.f32 %v1742_v57, %v1739_v55 }
 0xe77   : > { %v1746_v59 = vadd.f32 %v1745_v58, %v1744_v56 }
 0xe79   : > { %1748 = vrot.lane.b32.xlu0 %v1746_v59, %s6090_s19 }
 0xeae   : > { %v2107_v3 = vpop.permute.xlu1 %2106 }
 0xeaf   : > { %v2109_v5 = vmul.f32 %v5141_v2, %v2107_v3 }
 0xeb1   : > { %2111 = vrot.lane.b32.xlu1 %v2109_v5, %s6092_s2 }
 0xeeb   : > { %v1749_v8 = vpop.permute.xlu0 %1748 }
 0xeec   : > { %4583 = vst.msk [vmem:[%s5557_s1 + $0x8] sm:$0xff] %vm745_vm4, %v1749_v8  ;;  %4900 = vmatmul.mubr.msk.f32.vlgmr.msra.gmra.mxu0 %vm745_vm4, %v1749_v8 }
 0xeed   : > { %4908 = vmatpush3.msk.msra.mxu0 %vm749_vm3, %v4607_v4  ;;  %4909 = vmatprep.mubr.msk.f32.mxu0 %vm5236_vm1, %v5235_v6 }
 0xeee   : > { %4917 = vmatprep.subr.mxu0 %v5235_v6 }
 0xef0   : > { %4910 = vmatmul.mubr.msk.f32.vlgmr.msra.gmra.mxu0 %vm745_vm4, %v2025_v47 }
 0xef1   : > { %4918 = vmatpush3.msk.msra.mxu0 %vm749_vm3, %v4607_v4  ;;  %4919 = vmatprep.mubr.msk.f32.mxu0 %vm5236_vm1, %v5235_v6 }
 0xef2   : > { %4927 = vmatprep.subr.mxu0 %v5235_v6 }
 0xf23   : > { %v2112_v9 = vpop.permute.xlu1 %2111 }
 0xf24   : > { %v2114_v10 = vadd.f32 %v2112_v9, %v2020_v60 }
 0xf26   : > { %5142 = vtanh.f32 %v2114_v10 }
 0xf33   : > { %v5143_v13 = vpop.eup %5142 }
 0xf34   : > { %2118 = vrot.lane.b32.xlu1 %v5143_v13, %s6090_s19 }
 0xfa6   : > { %v2119_v17 = vpop.permute.xlu1 %2118 }
 0xfa7   : > { %v2121_v19 = vmul.f32 %v2119_v17, %v2116_v14 }
 0xfa9   : > { %v5656_v20 = vadd.f32 %v2122_v18, %v2121_v19 }
 0xfab   : > { %2197 = vrot.lane.b32.xlu1 %v5656_v20, %s6090_s19 }
 0xfac   : > { %v2192_v22 = vpop.f32.mrf.mxu0 }
 0xfad   : > { %v2193_v53 = vadd.f32 %v5611_v25, %v2192_v22 }
 0xfae   : > { %v4901_v23 = vpop.f32.mrf.mxu0 }
 0xfb0   : > { %v2388_v24 = vpop.f32.mrf.mxu0 }
 0xfb1   : > { %v2389_v38 = vadd.f32 %v5694_v12, %v2388_v24 }
 0xfb2   : > { %v4911_v26 = vpop.f32.mrf.mxu0 }
0x101d   : > { %v2198_v28 = vpop.permute.xlu1 %2197 }
0x101e   : > { %4905 = vmatmul.mubr.msk.f32.vlgmr.msra.gmra.mxu1 %vm745_vm4, %v2198_v28  ;;  %4920 = vmatmul.mubr.msk.f32.vlgmr.msra.gmra.mxu0 %vm745_vm4, %v2198_v28 }
0x101f   : > { %4913 = vmatpush3.msk.msra.mxu1 %vm749_vm3, %v4608_v27  ;;  %4914 = vmatprep.mubr.msk.f32.mxu1 %vm5236_vm1, %v5235_v6 }
0x1020   : > { %4922 = vmatprep.subr.mxu1 %v5235_v6  ;;  %4928 = vmatpush3.msk.msra.mxu0 %vm749_vm3, %v4607_v4 }
0x1021   : > { %4929 = vmatprep.mubr.msk.f32.mxu0 %vm5236_vm1, %v5235_v6  ;;  %4937 = vmatprep.subr.mxu0 %v5235_v6 }
0x1022   : > { %4915 = vmatmul.mubr.msk.f32.vlgmr.msra.gmra.mxu1 %vm745_vm4, %v5669_v29 }
0x1023   : > { %4923 = vmatpush3.msk.msra.mxu1 %vm749_vm3, %v4608_v27  ;;  %4924 = vmatprep.mubr.msk.f32.mxu1 %vm5236_vm1, %v5235_v6 }
0x1024   : > { %4932 = vmatprep.subr.mxu1 %v5235_v6 }
0x10de   : > { %v2267_v30 = vpop.f32.mrf.mxu1  ;;  %v5682_v31 = vpop.f32.mrf.mxu0 }
0x10df   : > { %v2268_v52 = vadd.f32 %v5604_v21, %v2267_v30  ;;  %v2570_v10 = vadd.f32 %v5694_v12, %v5682_v31 }
0x10e0   : > { %v4906_v32 = vpop.f32.mrf.mxu1  ;;  %v4921_v33 = vpop.f32.mrf.mxu0 }
0x10e1   : > { %v2271_v54 = vadd.f32 %v2268_v52, %v2193_v53 }
0x10e2   : > { %v2470_v35 = vpop.f32.mrf.mxu1 }
0x10e3   : > { %v2471_v36 = vadd.f32 %v5687_v34, %v2470_v35  ;;  %v4605_v55 = vmul.f32 -1.442695, %v2271_v54 }
0x10e4   : > { %v4916_v37 = vpop.f32.mrf.mxu1 }
0x10e5   : > { %2482 = vrot.lane.b32.xlu1 %v2471_v36, %s6091_s26  ;;  %v2474_v16 = vadd.f32 %v2471_v36, %v2389_v38 }
0x10e7   : > { %v4618_v39 = vmul.f32 -1.442695, %v2474_v16 }
0x10e9   : > { %5144 = vpow2.f32 %v4618_v39  ;;  %v5746_v39 = vld [vmem:[%s6057_s7 + $0x18] sm:$0x1f] }
0x10f6   : > { %v5145_v40 = vpop.eup %5144 }
0x10f7   : > { %v2478_v41 = vadd.f32 1.0, %v5145_v40 }
0x10f9   : > { %5146 = vrcp.f32 %v2478_v41  ;;  %v5755_v41 = vld [vmem:[%s5425_s29 + $0x20] sm:$0xff] }
0x1106   : > { %v5147_v42 = vpop.eup %5146 }
0x1107   : > { %v2492_v48 = vsub.f32 1.0, %v5147_v42 }
0x1157   : > { %v2483_v43 = vpop.permute.xlu1 %2482 }
0x1158   : > { %v2485_v44 = vmul.f32 %v5147_v42, %v2483_v43 }
0x115a   : > { %2487 = vrot.lane.b32.xlu0 %v2485_v44, %s6092_s2 }
0x115e   : > { %2498 = vrot.lane.b32.xlu0 %v5669_v29, %s6089_s24 }
0x11cc   : > { %v2488_v45 = vpop.permute.xlu0 %2487 }
0x11cd   : > { %v2490_v46 = vadd.f32 %v2488_v45, %v2389_v38 }
0x11cf   : > { %5148 = vtanh.f32 %v2490_v46  ;;  %v5774_v46 = vld [vmem:[%s6059_s9 + $0x3] ss:$0 sm:$0xff] }
0x11d0   : > { %v2499_v7 = vpop.permute.xlu0 %2498  ;;  %5150 = vpow2.f32 %v4605_v55 }
0x11d1   : > { %v2501_v11 = vmul.f32 %v5147_v42, %v2499_v7 }
0x11dc   : > { %v5149_v47 = vpop.eup %5148 }
0x11dd   : > { %2494 = vrot.lane.b32.xlu1 %v5149_v47, %s6090_s19  ;;  %v5151_v57 = vpop.eup %5150 }
0x11de   : > { %v2275_v58 = vadd.f32 1.0, %v5151_v57 }
0x11e0   : > { %5152 = vrcp.f32 %v2275_v58 }
0x11ed   : > { %v5153_v21 = vpop.eup %5152 }
0x11ee   : > { %v2289_v3 = vsub.f32 1.0, %v5153_v21  ;;  %v2295_v4 = vmul.f32 %v5153_v21, %v5656_v20  ;;  %v4630_v20 = vld [vmem:[%s6056_s6 + $0x18] sm:$0x1f] }
0x124f   : > { %v2495_v49 = vpop.permute.xlu1 %2494 }
0x1250   : > { %v2497_v50 = vmul.f32 %v2495_v49, %v2492_v48  ;;  %v5781_v49 = vld [vmem:[%s6058_s8 + $0x3] ss:$0 sm:$0xff] }
0x1252   : > { %v5701_v51 = vadd.f32 %v2501_v11, %v2497_v50 }
0x1254   : > { %2574 = vrot.lane.b32.xlu1 %v5701_v51, %s6090_s19 }
0x1258   : > { %2279 = vrot.lane.b32.xlu1 %v2268_v52, %s6091_s26 }
0x12c6   : > { %v2575_v56 = vpop.permute.xlu1 %2574 }
0x12c7   : > { %4925 = vmatmul.mubr.msk.f32.vlgmr.msra.gmra.mxu1 %vm745_vm4, %v2575_v56 }
0x12c8   : > { %4933 = vmatpush3.msk.msra.mxu1 %vm749_vm3, %v4608_v27  ;;  %4934 = vmatprep.mubr.msk.f32.mxu1 %vm5236_vm1, %v5235_v6 }
0x12c9   : > { %4942 = vmatprep.subr.mxu1 %v5235_v6 }
0x12ca   : > { %v2280_v59 = vpop.permute.xlu1 %2279 }
0x12cb   : > { %v2282_v60 = vmul.f32 %v5153_v21, %v2280_v59 }
0x12cd   : > { %2284 = vrot.lane.b32.xlu1 %v2282_v60, %s6092_s2 }
0x133f   : > { %v2285_v25 = vpop.permute.xlu1 %2284 }
0x1340   : > { %v2287_v62 = vadd.f32 %v2285_v25, %v2193_v53 }
0x1342   : > { %5154 = vtanh.f32 %v2287_v62 }
0x134f   : > { %v5155_v63 = vpop.eup %5154 }
0x1350   : > { %2291 = vrot.lane.b32.xlu1 %v5155_v63, %s6090_s19 }
0x1387   : > { %v2644_v0 = vpop.f32.mrf.mxu1 }
0x1388   : > { %v2645_v1 = vadd.f32 %v5687_v34, %v2644_v0 }
0x1389   : > { %v4926_v2 = vpop.f32.mrf.mxu1 }
0x138a   : > { %2656 = vrot.lane.b32.xlu0 %v2645_v1, %s6091_s26  ;;  %v2648_v13 = vadd.f32 %v2645_v1, %v2570_v10 }
0x138c   : > { %v4623_v14 = vmul.f32 -1.442695, %v2648_v13 }
0x138e   : > { %5156 = vpow2.f32 %v4623_v14 }
0x139b   : > { %v5157_v17 = vpop.eup %5156 }
0x139c   : > { %v2652_v18 = vadd.f32 1.0, %v5157_v17 }
0x139e   : > { %5158 = vrcp.f32 %v2652_v18 }
0x13ab   : > { %v5159_v19 = vpop.eup %5158 }
0x13ac   : > { %v2666_v30 = vsub.f32 1.0, %v5159_v19  ;;  %v2672_v32 = vmul.f32 %v5159_v19, %v5701_v51 }
0x13c2   : > { %v2292_v5 = vpop.permute.xlu1 %2291 }
0x13c3   : > { %v2294_v8 = vmul.f32 %v2292_v5, %v2289_v3 }
0x13c5   : > { %v2296_v9 = vadd.f32 %v2295_v4, %v2294_v8 }
0x13c7   : > { %2298 = vrot.lane.b32.xlu1 %v2296_v9, %s6090_s19 }
0x13fc   : > { %v2657_v22 = vpop.permute.xlu0 %2656 }
0x13fd   : > { %v2659_v23 = vmul.f32 %v5159_v19, %v2657_v22 }
0x13ff   : > { %2661 = vrot.lane.b32.xlu0 %v2659_v23, %s6092_s2 }
0x1439   : > { %v2299_v24 = vpop.permute.xlu1 %2298 }
0x143a   : > { %4606 = vst.msk [vmem:[%s5557_s1 + $0x10] sm:$0xff] %vm745_vm4, %v2299_v24  ;;  %4930 = vmatmul.mubr.msk.f32.vlgmr.msra.gmra.mxu0 %vm745_vm4, %v2299_v24 }
0x143b   : > { %4938 = vmatpush3.msk.msra.mxu0 %vm749_vm3, %v4630_v20  ;;  %4939 = vmatprep.mubr.msk.f32.mxu0 %vm5236_vm1, %v5235_v6 }
0x143c   : > { %4947 = vmatprep.subr.mxu0 %v5235_v6 }
0x143e   : > { %4940 = vmatmul.mubr.msk.f32.vlgmr.msra.gmra.mxu0 %vm745_vm4, %v2575_v56 }
0x143f   : > { %4948 = vmatpush3.msk.msra.mxu0 %vm749_vm3, %v4630_v20  ;;  %4949 = vmatprep.mubr.msk.f32.mxu0 %vm5236_vm1, %v5235_v6 }
0x1440   : > { %4957 = vmatprep.subr.mxu0 %v5235_v6 }
0x1471   : > { %v2662_v26 = vpop.permute.xlu0 %2661 }
0x1472   : > { %v2664_v27 = vadd.f32 %v2662_v26, %v2570_v10 }
0x1474   : > { %5160 = vtanh.f32 %v2664_v27 }
0x1481   : > { %v5161_v28 = vpop.eup %5160 }
0x1482   : > { %2668 = vrot.lane.b32.xlu0 %v5161_v28, %s6090_s19 }
0x14f4   : > { %v2669_v31 = vpop.permute.xlu0 %2668 }
0x14f5   : > { %v2671_v33 = vmul.f32 %v2669_v31, %v2666_v30 }
0x14f7   : > { %v5739_v35 = vadd.f32 %v2672_v32, %v2671_v33 }
0x14f9   : > { %2747 = vrot.lane.b32.xlu0 %v5739_v35, %s6090_s19 }
0x14fa   : > { %v2742_v36 = vpop.f32.mrf.mxu0 }
0x14fb   : > { %v2743_v56 = vadd.f32 %v5694_v12, %v2742_v36 }
0x14fc   : > { %v4931_v37 = vpop.f32.mrf.mxu0 }
0x14fe   : > { %v2938_v38 = vpop.f32.mrf.mxu0 }
0x14ff   : > { %v2939_v11 = vadd.f32 %v5781_v49, %v2938_v38 }
0x1500   : > { %v4941_v16 = vpop.f32.mrf.mxu0 }
0x156b   : > { %v2748_v40 = vpop.permute.xlu0 %2747 }
0x156c   : > { %4935 = vmatmul.mubr.msk.f32.vlgmr.msra.gmra.mxu1 %vm745_vm4, %v2748_v40  ;;  %4950 = vmatmul.mubr.msk.f32.vlgmr.msra.gmra.mxu0 %vm745_vm4, %v2748_v40 }
0x156d   : > { %4943 = vmatpush3.msk.msra.mxu1 %vm749_vm3, %v5746_v39  ;;  %4944 = vmatprep.mubr.msk.f32.mxu1 %vm5236_vm1, %v5235_v6 }
0x156e   : > { %4952 = vmatprep.subr.mxu1 %v5235_v6  ;;  %4958 = vmatpush3.msk.msra.mxu0 %vm749_vm3, %v4630_v20 }
0x156f   : > { %4959 = vmatprep.mubr.msk.f32.mxu0 %vm5236_vm1, %v5235_v6  ;;  %4967 = vmatprep.subr.mxu0 %v5235_v6 }
0x1570   : > { %4945 = vmatmul.mubr.msk.f32.vlgmr.msra.gmra.mxu1 %vm745_vm4, %v5755_v41 }
0x1571   : > { %4953 = vmatpush3.msk.msra.mxu1 %vm749_vm3, %v5746_v39  ;;  %4954 = vmatprep.mubr.msk.f32.mxu1 %vm5236_vm1, %v5235_v6 }
0x1572   : > { %4962 = vmatprep.subr.mxu1 %v5235_v6 }
0x162c   : > { %v2817_v42 = vpop.f32.mrf.mxu1  ;;  %v5769_v43 = vpop.f32.mrf.mxu0 }
0x162d   : > { %v2818_v58 = vadd.f32 %v5687_v34, %v2817_v42  ;;  %v3120_v30 = vadd.f32 %v5781_v49, %v5769_v43  ;;  %v3405_v43 = vld [vmem:[%s6060_s10] sm:$0x1f] }
0x162e   : > { %v4936_v44 = vpop.f32.mrf.mxu1  ;;  %v4951_v45 = vpop.f32.mrf.mxu0 }
0x162f   : > { %v2821_v21 = vadd.f32 %v2818_v58, %v2743_v56  ;;  %v3404_v45 = vld [vmem:[%s5425_s29] sm:$0xff] }
0x1630   : > { %v3020_v47 = vpop.f32.mrf.mxu1 }
0x1631   : > { %v3021_v7 = vadd.f32 %v5774_v46, %v3020_v47  ;;  %v4628_v59 = vmul.f32 -1.442695, %v2821_v21  ;;  %v4658_v47 = vld [vmem:[%s6060_s10 + $0x8] sm:$0x1f] }
0x1632   : > { %v4946_v48 = vpop.f32.mrf.mxu1 }
0x1633   : > { %3032 = vrot.lane.b32.xlu0 %v3021_v7, %s6091_s26  ;;  %v3024_v50 = vadd.f32 %v3021_v7, %v2939_v11  ;;  %v4666_v7 = vld [vmem:[%s6060_s10 + $0x18] sm:$0x1f] }
0x1635   : > { %v4641_v51 = vmul.f32 -1.442695, %v3024_v50 }
0x1637   : > { %5162 = vpow2.f32 %v4641_v51 }
0x1644   : > { %v5163_v52 = vpop.eup %5162 }
0x1645   : > { %v3028_v53 = vadd.f32 1.0, %v5163_v52  ;;  %v3403_v52 = vld [vmem:[%s6061_s11] sm:$0x3f] }
0x1647   : > { %5164 = vrcp.f32 %v3028_v53 }
0x1648   : > { %5166 = vpow2.f32 %v4628_v59 }
0x1654   : > { %v5165_v54 = vpop.eup %5164 }
0x1655   : > { %v5167_v60 = vpop.eup %5166  ;;  %v3042_v4 = vsub.f32 1.0, %v5165_v54 }
0x1656   : > { %v2825_v25 = vadd.f32 1.0, %v5167_v60 }
0x1658   : > { %5168 = vrcp.f32 %v2825_v25  ;;  %v3896_v25 = vld [vmem:[%s6063_s13 + $0x10] sm:$0xff] }
0x1665   : > { %v5169_v1 = vpop.eup %5168 }
0x1666   : > { %v2839_v18 = vsub.f32 1.0, %v5169_v1  ;;  %v2845_v22 = vmul.f32 %v5169_v1, %v5739_v35 }
0x16a5   : > { %v3033_v55 = vpop.permute.xlu0 %3032 }
0x16a6   : > { %v3035_v57 = vmul.f32 %v5165_v54, %v3033_v55  ;;  %v4670_v55 = vld [vmem:[%s6060_s10 + $0x20] sm:$0x1f] }
0x16a8   : > { %3037 = vrot.lane.b32.xlu1 %v3035_v57, %s6092_s2 }
0x16ac   : > { %3048 = vrot.lane.b32.xlu1 %v5755_v41, %s6089_s24 }
0x16b0   : > { %2829 = vrot.lane.b32.xlu1 %v2818_v58, %s6091_s26 }
0x171a   : > { %v3038_v62 = vpop.permute.xlu1 %3037 }
0x171b   : > { %v3040_v63 = vadd.f32 %v3038_v62, %v2939_v11  ;;  %v3895_v62 = vld [vmem:[%s6063_s13 + $0x8] sm:$0xff] }
0x171d   : > { %5170 = vtanh.f32 %v3040_v63  ;;  %v3894_v63 = vld [vmem:[%s6063_s13] sm:$0xff] }
0x171e   : > { %v3049_v0 = vpop.permute.xlu1 %3048 }
0x171f   : > { %v3051_v9 = vmul.f32 %v5165_v54, %v3049_v0  ;;  %v5210_v54 = vld [vmem:[%s5411_s22] sm:$0xff] }
0x1722   : > { %v2830_v2 = vpop.permute.xlu1 %2829 }
0x1723   : > { %v2832_v3 = vmul.f32 %v5169_v1, %v2830_v2 }
0x1725   : > { %2834 = vrot.lane.b32.xlu1 %v2832_v3, %s6092_s2 }
0x172a   : > { %v5171_v34 = vpop.eup %5170 }
0x172b   : > { %3044 = vrot.lane.b32.xlu0 %v5171_v34, %s6090_s19 }
0x1797   : > { %v2835_v5 = vpop.permute.xlu1 %2834 }
0x1798   : > { %v2837_v12 = vadd.f32 %v2835_v5, %v2743_v56 }
0x179a   : > { %5172 = vtanh.f32 %v2837_v12 }
0x179d   : > { %v3045_v8 = vpop.permute.xlu0 %3044 }
0x179e   : > { %v3047_v10 = vmul.f32 %v3045_v8, %v3042_v4 }
0x17a0   : > { %v3052_v13 = vadd.f32 %v3051_v9, %v3047_v10 }
0x17a2   : > { %3124 = vrot.lane.b32.xlu0 %v3052_v13, %s6090_s19 }
0x17a7   : > { %v5173_v14 = vpop.eup %5172 }
0x17a8   : > { %2841 = vrot.lane.b32.xlu1 %v5173_v14, %s6090_s19  ;;  %v4673_v14 = vld [vmem:[%s6062_s12] ss:$0 sm:$0xff] }
0x1814   : > { %v3125_v17 = vpop.permute.xlu0 %3124 }
0x1815   : > { %4955 = vmatmul.mubr.msk.f32.vlgmr.msra.gmra.mxu1 %vm745_vm4, %v3125_v17 }
0x1816   : > { %4963 = vmatpush3.msk.msra.mxu1 %vm749_vm3, %v5746_v39  ;;  %4964 = vmatprep.mubr.msk.f32.mxu1 %vm5236_vm1, %v5235_v6 }
0x1817   : > { %4972 = vmatprep.subr.mxu1 %v5235_v6 }
0x181a   : > { %v2842_v19 = vpop.permute.xlu1 %2841 }
0x181b   : > { %v2844_v23 = vmul.f32 %v2842_v19, %v2839_v18 }
0x181d   : > { %v2846_v20 = vadd.f32 %v2845_v22, %v2844_v23 }
0x181f   : > { %2848 = vrot.lane.b32.xlu1 %v2846_v20, %s6090_s19 }
0x1891   : > { %v2849_v24 = vpop.permute.xlu1 %2848 }
0x1892   : > { %4629 = vst.msk [vmem:[%s5557_s1 + $0x18] sm:$0xff] %vm745_vm4, %v2849_v24  ;;  %4960 = vmatmul.mubr.msk.f32.vlgmr.msra.gmra.mxu0 %vm745_vm4, %v2849_v24 }
0x1893   : > { %4969 = vmatprep.mubr.msk.f32.mxu0 %vm5236_vm1, %v5235_v6  ;;  %4968 = vmatpush3.msk.msra.mxu0 %vm749_vm3, %v3405_v43 }
0x1894   : > { %4977 = vmatprep.subr.mxu0 %v5235_v6 }
0x1896   : > { %4970 = vmatmul.mubr.msk.f32.vlgmr.msra.gmra.mxu0 %vm745_vm4, %v3404_v45 }
0x1897   : > { %4979 = vmatprep.mubr.msk.f32.mxu0 %vm5236_vm1, %v5235_v6  ;;  %4978 = vmatpush3.msk.msra.mxu0 %vm749_vm3, %v4658_v47 }
0x1898   : > { %4987 = vmatprep.subr.mxu0 %v5235_v6 }
0x189a   : > { %4980 = vmatmul.mubr.msk.f32.vlgmr.msra.gmra.mxu0 %vm745_vm4, %v5498_v61 }
0x189b   : > { %4989 = vmatprep.mubr.msk.f32.mxu0 %vm5236_vm1, %v5235_v6  ;;  %4988 = vmatpush3.msk.msra.mxu0 %vm749_vm3, %v4666_v7 }
0x189c   : > { %4997 = vmatprep.subr.mxu0 %v5235_v6 }
0x189e   : > { %4990 = vmatmul.mubr.msk.f32.vlgmr.msra.gmra.mxu0 %vm745_vm4, %v5669_v29  ;;  %v4662_v29 = vld [vmem:[%s6060_s10 + $0x10] sm:$0x1f] }
0x189f   : > { %5007 = vmatprep.mubr.msk.f32.mxu0 %vm5236_vm1, %v5235_v6 }
0x18d5   : > { %v3194_v26 = vpop.f32.mrf.mxu1 }
0x18d6   : > { %v3195_v27 = vadd.f32 %v5774_v46, %v3194_v26 }
0x18d7   : > { %v4956_v28 = vpop.f32.mrf.mxu1 }
0x18d8   : > { %3206 = vrot.lane.b32.xlu0 %v3195_v27, %s6091_s26  ;;  %v3198_v31 = vadd.f32 %v3195_v27, %v3120_v30 }
0x18da   : > { %v4646_v32 = vmul.f32 -1.442695, %v3198_v31 }
0x18dc   : > { %5174 = vpow2.f32 %v4646_v32 }
0x18e9   : > { %v5175_v33 = vpop.eup %5174 }
0x18ea   : > { %v3202_v35 = vadd.f32 1.0, %v5175_v33 }
0x18ec   : > { %5176 = vrcp.f32 %v3202_v35 }
0x18f9   : > { %v5177_v36 = vpop.eup %5176 }
0x18fa   : > { %v3216_v48 = vsub.f32 1.0, %v5177_v36  ;;  %v3222_v50 = vmul.f32 %v5177_v36, %v3052_v13 }
0x194a   : > { %v3207_v37 = vpop.permute.xlu0 %3206 }
0x194b   : > { %v3209_v38 = vmul.f32 %v5177_v36, %v3207_v37  ;;  %v4683_v36 = vld [vmem:[%s6063_s13 + $0x48] sm:$0xf]  ;;  %v4681_v37 = vld [vmem:[%s6063_s13 + $0x38] sm:$0xff] }
0x194d   : > { %3211 = vrot.lane.b32.xlu0 %v3209_v38, %s6092_s2  ;;  %v4680_v38 = vld [vmem:[%s6063_s13 + $0x30] sm:$0xff] }
0x1952   : > { %v5812_v16 = vpop.f32.mrf.mxu0 }
0x1953   : > { %v3293_v26 = vadd.f32 %v5781_v49, %v5812_v16  ;;  %v4682_v49 = vld [vmem:[%s6063_s13 + $0x40] sm:$0xff]  ;;  %v4679_v16 = vld [vmem:[%s6063_s13 + $0x28] sm:$0xff] }
0x1954   : > { %v4961_v39 = vpop.f32.mrf.mxu0 }
0x1956   : > { %v3478_v57 = vpop.f32.mrf.mxu0 }
0x1958   : > { %v4971_v58 = vpop.f32.mrf.mxu0 }
0x195a   : > { %v3634_v56 = vpop.f32.mrf.mxu0 }
0x195c   : > { %v4981_v21 = vpop.f32.mrf.mxu0 }
0x195e   : > { %v3794_v59 = vpop.f32.mrf.mxu0 }
0x1960   : > { %v4991_v60 = vpop.f32.mrf.mxu0 }
0x19bf   : > { %v3212_v40 = vpop.permute.xlu0 %3211 }
0x19c0   : > { %v3214_v42 = vadd.f32 %v3212_v40, %v3120_v30 }
0x19c2   : > { %5178 = vtanh.f32 %v3214_v42  ;;  %v4675_v42 = vld [vmem:[%s6064_s14] ss:$0 sm:$0xff] }
0x19cf   : > { %v5179_v44 = vpop.eup %5178 }
0x19d0   : > { %3218 = vrot.lane.b32.xlu0 %v5179_v44, %s6090_s19 }
0x1a42   : > { %v3219_v11 = vpop.permute.xlu0 %3218 }
0x1a43   : > { %v3221_v51 = vmul.f32 %v3219_v11, %v3216_v48 }
0x1a45   : > { %v5842_v61 = vadd.f32 %v3222_v50, %v3221_v51 }
0x1a47   : > { %3297 = vrot.lane.b32.xlu0 %v5842_v61, %s6090_s19 }
0x1ab9   : > { %v3298_v53 = vpop.permute.xlu0 %3297 }
0x1aba   : > { %4965 = vmatmul.mubr.msk.f32.vlgmr.msra.gmra.mxu1 %vm745_vm4, %v3298_v53  ;;  %v4692_v53 = vld [vmem:[%s6063_s13 + $0x68] sm:$0xff] }
0x1abb   : > { %4973 = vmatpush3.msk.msra.mxu1 %vm3485_vm5, %v3403_v52  ;;  %4974 = vmatprep.mubr.msk.f32.mxu1 %vm5236_vm1, %v5235_v6  ;;  %v4693_v52 = vld [vmem:[%s6063_s13 + $0x70] sm:$0xf] }
0x1abc   : > { %4982 = vmatprep.subr.mxu1 %v5235_v6 }
0x1abe   : > { %4975 = vmatmul.mubr.msk.f32.vlgmr.msra.gmra.mxu1 %vm3482_vm6, %v5210_v54  ;;  %v4690_v54 = vld [vmem:[%s6063_s13 + $0x58] sm:$0xff] }
0x1abf   : > { %4983 = vmatpush3.msk.msra.mxu1 %vm749_vm3, %v4662_v29  ;;  %4984 = vmatprep.mubr.msk.f32.mxu1 %vm5236_vm1, %v5235_v6  ;;  %v4691_v29 = vld [vmem:[%s6063_s13 + $0x60] sm:$0xff] }
0x1ac0   : > { %4992 = vmatprep.subr.mxu1 %v5235_v6 }
0x1ac2   : > { %4985 = vmatmul.mubr.msk.f32.vlgmr.msra.gmra.mxu1 %vm745_vm4, %v5586_v15  ;;  %v3898_v15 = vld [vmem:[%s6063_s13 + $0x20] sm:$0xf] }
0x1ac3   : > { %4993 = vmatpush3.msk.msra.mxu1 %vm749_vm3, %v4670_v55  ;;  %4994 = vmatprep.mubr.msk.f32.mxu1 %vm5236_vm1, %v5235_v6  ;;  %v4689_v55 = vld [vmem:[%s6063_s13 + $0x50] sm:$0xff] }
0x1ac4   : > { %5010 = vmatprep.subr.mxu1 %v5235_v6  ;;  %4998 = vmatpush3.msk.msra.mxu0 %vm3910_vm7, %v3898_v15 }
0x1ac5   : > { %4999 = vmatprep.subr.mxu0 %v5235_v6 }
0x1ac6   : > { %4995 = vmatmul.mubr.msk.f32.vlgmr.msra.gmra.mxu1 %vm745_vm4, %v5755_v41  ;;  %v3897_v41 = vld [vmem:[%s6063_s13 + $0x18] sm:$0xff] }
0x1ac7   : > { %5020 = vmatprep.mubr.msk.f32.mxu1 %vm5236_vm1, %v5235_v6  ;;  %5000 = vmatpush3.msra.mxu0 %v3897_v41 }
0x1ac8   : > { %5001 = vmatprep.subr.mxu0 %v5235_v6  ;;  %5011 = vmatpush3.msk.msra.mxu1 %vm3910_vm7, %v4683_v36 }
0x1ac9   : > { %5002 = vmatpush3.msra.mxu0 %v3896_v25  ;;  %5012 = vmatprep.subr.mxu1 %v5235_v6 }
0x1aca   : > { %5003 = vmatprep.subr.mxu0 %v5235_v6  ;;  %5013 = vmatpush3.msra.mxu1 %v4682_v49 }
0x1acb   : > { %5004 = vmatpush3.msra.mxu0 %v3895_v62  ;;  %5014 = vmatprep.subr.mxu1 %v5235_v6  ;;  %v4703_v62 = vld [vmem:[%s6063_s13 + $0x98] sm:$0xf] }
0x1acc   : > { %5005 = vmatprep.subr.mxu0 %v5235_v6  ;;  %5015 = vmatpush3.msra.mxu1 %v4681_v37 }
0x1acd   : > { %5006 = vmatpush3.msra.mxu0 %v3894_v63  ;;  %5016 = vmatprep.subr.mxu1 %v5235_v6  ;;  %v4702_v63 = vld [vmem:[%s6063_s13 + $0x90] sm:$0xff] }
0x1ace   : > { %5023 = vmatprep.subr.mxu0 %v5235_v6  ;;  %5017 = vmatpush3.msra.mxu1 %v4680_v38 }
0x1acf   : > { %5018 = vmatprep.subr.mxu1 %v5235_v6 }
0x1ad0   : > { %5019 = vmatpush3.msra.mxu1 %v4679_v16 }
0x1ad1   : > { %5036 = vmatprep.subr.mxu1 %v5235_v6 }
0x1b7a   : > { %v3367_v0 = vpop.f32.mrf.mxu1 }
0x1b7b   : > { %v3368_v1 = vadd.f32 %v5774_v46, %v3367_v0  ;;  %v4701_v0 = vld [vmem:[%s6063_s13 + $0x88] sm:$0xff] }
0x1b7c   : > { %v4966_v2 = vpop.f32.mrf.mxu1 }
0x1b7d   : > { %3379 = vrot.lane.b32.xlu1 %v3368_v1, %s6091_s26  ;;  %v3371_v27 = vadd.f32 %v3368_v1, %v3293_v26  ;;  %v4700_v1 = vld [vmem:[%s6063_s13 + $0x80] sm:$0xff]  ;;  %v4699_v2 = vld [vmem:[%s6063_s13 + $0x78] sm:$0xff] }
0x1b7e   : > { %v3555_v3 = vpop.f32.mrf.mxu1 }
0x1b7f   : > { %v3556_v34 = vadd.f32 %v3555_v3, %v3478_v57  ;;  %v4651_v28 = vmul.f32 -1.442695, %v3371_v27  ;;  %v4685_v57 = vld [vmem:[%s6064_s14 + $0x1] ss:$0 sm:$0xff]  ;;  %v4695_v3 = vld [vmem:[%s6064_s14 + $0x2] ss:$0 sm:$0xff] }
0x1b80   : > { %v4976_v5 = vpop.f32.mrf.mxu1 }
0x1b81   : > { %v3638_v12 = vadd.f32 %v3634_v56, %v3556_v34 }
0x1b82   : > { %v3714_v4 = vpop.f32.mrf.mxu1 }
0x1b83   : > { %v3718_v8 = vadd.f32 %v3714_v4, %v3638_v12 }
0x1b84   : > { %v4986_v9 = vpop.f32.mrf.mxu1 }
0x1b85   : > { %v3798_v10 = vadd.f32 %v3794_v59, %v3718_v8 }
0x1b86   : > { %v3874_v13 = vpop.f32.mrf.mxu1 }
0x1b87   : > { %v3878_v17 = vadd.f32 %v3874_v13, %v3798_v10 }
0x1b88   : > { %v4996_v18 = vpop.f32.mrf.mxu1 }
0x1b89   : > { %v3886_v19 = vadd.f32 %v4673_v14, %v3878_v17  ;;  %v4286_v14 = vld [vmem:[%s6065_s15 + $0x20] sm:$0xf]  ;;  %v4285_v17 = vld [vmem:[%s6065_s15 + $0x18] sm:$0xff]  ;;  %v4284_v18 = vld [vmem:[%s6065_s15 + $0x10] sm:$0xff] }
0x1b8b   : > { %v4674_v46 = vmul.f32 -1.442695, %v3886_v19 }
0x1b8d   : > { %5180 = vpow2.f32 %v4674_v46  ;;  %v4282_v46 = vld [vmem:[%s6065_s15] sm:$0xff] }
0x1b9a   : > { %v5181_v22 = vpop.eup %5180 }
0x1b9b   : > { %v3890_v23 = vadd.f32 1.0, %v5181_v22  ;;  %v4705_v22 = vld [vmem:[%s6064_s14 + $0x3] ss:$0 sm:$0xff] }
0x1b9d   : > { %5182 = vrcp.f32 %v3890_v23 }
0x1b9e   : > { %5184 = vpow2.f32 %v4651_v28 }
0x1baa   : > { %v5183_v20 = vpop.eup %5182 }
0x1bab   : > { %v3893_v24 = vmul.f32 %v5183_v20, %v3886_v19  ;;  %v5185_v30 = vpop.eup %5184  ;;  %v4283_v19 = vld [vmem:[%s6065_s15 + $0x8] sm:$0xff] }
0x1bac   : > { %v3375_v31 = vadd.f32 1.0, %v5185_v30 }
0x1bad   : > { %5008 = vmatmul.mubr.msk.f32.vlgmr.msra.gmra.mxu0 %vm3906_vm8, %v3893_v24 }
0x1bae   : > { %5033 = vmatprep.mubr.msk.f32.mxu0 %vm5236_vm1, %v5235_v6  ;;  %5186 = vrcp.f32 %v3375_v31  ;;  %5024 = vmatpush3.msk.msra.mxu0 %vm3910_vm7, %v4693_v52  ;;  %v4438_v52 = vld [vmem:[%s5557_s1 + $0x18] sm:$0xff] (%p5369_p5) }
0x1baf   : > { %5025 = vmatprep.subr.mxu0 %v5235_v6 }
0x1bb0   : > { %5026 = vmatpush3.msra.mxu0 %v4692_v53 }
0x1bb1   : > { %5027 = vmatprep.subr.mxu0 %v5235_v6 }
0x1bb2   : > { %5028 = vmatpush3.msra.mxu0 %v4691_v29 }
0x1bb3   : > { %5029 = vmatprep.subr.mxu0 %v5235_v6 }
0x1bb4   : > { %5030 = vmatpush3.msra.mxu0 %v4690_v54 }
0x1bb5   : > { %5031 = vmatprep.subr.mxu0 %v5235_v6 }
0x1bb6   : > { %5032 = vmatpush3.msra.mxu0 %v4689_v55 }
0x1bb7   : > { %5049 = vmatprep.subr.mxu0 %v5235_v6 }
0x1bbb   : > { %v5905_v32 = vpop.eup %5186 }
0x1bbc   : > { %v3389_v38 = vsub.f32 1.0, %v5905_v32 }
0x1bef   : > { %v3380_v33 = vpop.permute.xlu1 %3379 }
0x1bf0   : > { %v3382_v35 = vmul.f32 %v5905_v32, %v3380_v33 }
0x1bf2   : > { %3384 = vrot.lane.b32.xlu0 %v3382_v35, %s6092_s2 }
0x1c64   : > { %v3385_v39 = vpop.permute.xlu0 %3384 }
0x1c65   : > { %v3387_v40 = vadd.f32 %v3385_v39, %v3293_v26  ;;  %v3395_v39 = vmul.f32 %v5905_v32, %v5842_v61  ;;  %v4432_v32 = vld [vmem:[%s5557_s1] sm:$0xff] (%p5369_p5) }
0x1c67   : > { %5188 = vtanh.f32 %v3387_v40 }
0x1c6d   : > { %v3980_v43 = vpop.f32.mrf.mxu0 }
0x1c6e   : > { %v3981_v44 = vadd.f32 %v4675_v42, %v3980_v43 }
0x1c6f   : > { %v5009_v45 = vpop.f32.mrf.mxu0 }
0x1c70   : > { %v4678_v47 = vmul.f32 -1.442695, %v3981_v44 }
0x1c72   : > { %5190 = vpow2.f32 %v4678_v47 }
0x1c74   : > { %v5189_v7 = vpop.eup %5188 }
0x1c75   : > { %3391 = vrot.lane.b32.xlu0 %v5189_v7, %s6090_s19 }
0x1c7f   : > { %v5191_v48 = vpop.eup %5190 }
0x1c80   : > { %v3987_v11 = vadd.f32 1.0, %v5191_v48 }
0x1c82   : > { %5192 = vrcp.f32 %v3987_v11 }
0x1c8f   : > { %v5193_v50 = vpop.eup %5192 }
0x1c90   : > { %v3990_v51 = vmul.f32 %v5193_v50, %v3981_v44  ;;  %v4434_v50 = vld [vmem:[%s5557_s1 + $0x8] sm:$0xff] (%p5369_p5) }
0x1c92   : > { %5021 = vmatmul.mubr.msk.f32.vlgmr.msra.gmra.mxu1 %vm3906_vm8, %v3990_v51  ;;  %v4436_v51 = vld [vmem:[%s5557_s1 + $0x10] sm:$0xff] (%p5369_p5) }
0x1c93   : > { %5046 = vmatprep.mubr.msk.f32.mxu1 %vm5236_vm1, %v5235_v6  ;;  %5037 = vmatpush3.msk.msra.mxu1 %vm3910_vm7, %v4703_v62 }
0x1c94   : > { %5038 = vmatprep.subr.mxu1 %v5235_v6 }
0x1c95   : > { %5039 = vmatpush3.msra.mxu1 %v4702_v63 }
0x1c96   : > { %5040 = vmatprep.subr.mxu1 %v5235_v6 }
0x1c97   : > { %5041 = vmatpush3.msra.mxu1 %v4701_v0 }
0x1c98   : > { %5042 = vmatprep.subr.mxu1 %v5235_v6 }
0x1c99   : > { %5043 = vmatpush3.msra.mxu1 %v4700_v1 }
0x1c9a   : > { %5044 = vmatprep.subr.mxu1 %v5235_v6 }
0x1c9b   : > { %5045 = vmatpush3.msra.mxu1 %v4699_v2 }
0x1ce7   : > { %v3392_v37 = vpop.permute.xlu0 %3391 }
0x1ce8   : > { %v3394_v16 = vmul.f32 %v3392_v37, %v3389_v38 }
0x1cea   : > { %v3396_v40 = vadd.f32 %v3395_v39, %v3394_v16 }
0x1d52   : > { %v4077_v58 = vpop.f32.mrf.mxu1 }
0x1d53   : > { %v4078_v56 = vadd.f32 %v4685_v57, %v4077_v58 }
0x1d54   : > { %v5022_v21 = vpop.f32.mrf.mxu1 }
0x1d55   : > { %v4688_v59 = vmul.f32 -1.442695, %v4078_v56 }
0x1d57   : > { %5194 = vpow2.f32 %v4688_v59 }
0x1d64   : > { %v5195_v60 = vpop.eup %5194 }
0x1d65   : > { %v4084_v15 = vadd.f32 1.0, %v5195_v60 }
0x1d67   : > { %5196 = vrcp.f32 %v4084_v15 }
0x1d74   : > { %v5197_v41 = vpop.eup %5196 }
0x1d75   : > { %v4087_v25 = vmul.f32 %v5197_v41, %v4078_v56 }
0x1d77   : > { %5034 = vmatmul.mubr.msk.f32.vlgmr.msra.gmra.mxu0 %vm3906_vm8, %v4087_v25 }
0x1d78   : > { %5059 = vmatprep.mubr.msk.f32.mxu0 %vm5236_vm1, %v5235_v6  ;;  %5050 = vmatpush3.msk.msra.mxu0 %vm3910_vm7, %v4286_v14 }
0x1d79   : > { %5051 = vmatprep.subr.mxu0 %v5235_v6 }
0x1d7a   : > { %5052 = vmatpush3.msra.mxu0 %v4285_v17 }
0x1d7b   : > { %5053 = vmatprep.subr.mxu0 %v5235_v6 }
0x1d7c   : > { %5054 = vmatpush3.msra.mxu0 %v4284_v18 }
0x1d7d   : > { %5055 = vmatprep.subr.mxu0 %v5235_v6 }
0x1d7e   : > { %5056 = vmatpush3.msra.mxu0 %v4283_v19 }
0x1d7f   : > { %5057 = vmatprep.subr.mxu0 %v5235_v6  ;;  %v4709_v6 = vld [vmem:[%s6066_s16] ss:$0 sm:$0xff] }
0x1d80   : > { %5058 = vmatpush3.msra.mxu0 %v4282_v46 }
0x1e37   : > { %v4174_v34 = vpop.f32.mrf.mxu0 }
0x1e38   : > { %v4175_v5 = vadd.f32 %v4695_v3, %v4174_v34 }
0x1e39   : > { %v5035_v12 = vpop.f32.mrf.mxu0 }
0x1e3a   : > { %v4698_v4 = vmul.f32 -1.442695, %v4175_v5 }
0x1e3c   : > { %5198 = vpow2.f32 %v4698_v4 }
0x1e49   : > { %v5199_v8 = vpop.eup %5198 }
0x1e4a   : > { %v4181_v9 = vadd.f32 1.0, %v5199_v8 }
0x1e4c   : > { %5200 = vrcp.f32 %v4181_v9 }
0x1e59   : > { %v5201_v10 = vpop.eup %5200 }
0x1e5a   : > { %v4184_v13 = vmul.f32 %v5201_v10, %v4175_v5 }
0x1e5c   : > { %5047 = vmatmul.mubr.msk.f32.vlgmr.msra.gmra.mxu1 %vm3906_vm8, %v4184_v13 }
0x1f1c   : > { %v4271_v23 = vpop.f32.mrf.mxu1 }
0x1f1d   : > { %v4272_v20 = vadd.f32 %v4705_v22, %v4271_v23 }
0x1f1e   : > { %v5048_v24 = vpop.f32.mrf.mxu1 }
0x1f1f   : > { %v4708_v26 = vmul.f32 -1.442695, %v4272_v20 }
0x1f21   : > { %5202 = vpow2.f32 %v4708_v26 }
0x1f2e   : > { %v5203_v27 = vpop.eup %5202 }
0x1f2f   : > { %v4278_v28 = vadd.f32 1.0, %v5203_v27 }
0x1f31   : > { %5204 = vrcp.f32 %v4278_v28 }
0x1f3e   : > { %v5205_v30 = vpop.eup %5204 }
0x1f3f   : > { %v4281_v31 = vmul.f32 %v5205_v30, %v4272_v20 }
0x1f41   : > { %5060 = vmatmul.mubr.msk.f32.vlgmr.msra.gmra.mxu0 %vm3906_vm8, %v4281_v31 }
0x2001   : > { %v4366_v33 = vpop.f32.mrf.mxu0 }
0x2002   : > { %v4367_v35 = vadd.f32 %v4709_v6, %v4366_v33 }
0x2003   : > { %v5061_v36 = vpop.f32.mrf.mxu0 }
0x2004   : > { %v4371_v49 = vsel %vm4370_vm9, %v4367_v35, -inf }
0x2005   : > { %4372 = vmax.xlane.f32.xlu1 %v4371_v49 }
0x2016   : > { %3398 = vrot.lane.b32.xlu1 %v3396_v40, %s6090_s19  ;;  %s4712_s19 = sshll.u32 (%p5369_p5), %s5354_s30, 3 }
0x2017   : > { %s4395_s3 = scalar_lea.vmem (%p5369_p5), %s6067_s17, %s4712_s19 }
0x2018   : > { %4433 = vst [vmem:[%s4395_s3] sm:$0xff] (%p5369_p5), %v4432_v32  ;;  %4435 = vst [vmem:[%s4395_s3 + $0x18] sm:$0xff] (%p5369_p5), %v4434_v50 }
0x2019   : > { %4437 = vst [vmem:[%s4395_s3 + $0x30] sm:$0xff] (%p5369_p5), %v4436_v51  ;;  %4439 = vst [vmem:[%s4395_s3 + $0x48] sm:$0xff] (%p5369_p5), %v4438_v52 }
0x208e   : > { %v4373_v42 = vpop.xlane.xlu1 %4372 }
0x208f   : > { %v4374_v43 = vsub.f32 %v4367_v35, %v4373_v42 }
0x2091   : > { %v4375_v44 = vmul.f32 1.442695, %v4374_v43 }
0x2092   : > { %v3399_v45 = vpop.permute.xlu1 %3398 }
0x2093   : > { %5206 = vpow2.f32 %v4375_v44  ;;  %4652 = vst.msk [vmem:[%s5557_s1 + $0x20] sm:$0xff] %vm745_vm4, %v3399_v45 }
0x209a   : > { %v4440_v53 = vld [vmem:[%s5557_s1 + $0x20] sm:$0xff] (%p5369_p5) }
0x209b   : > { %4441 = vst [vmem:[%s4395_s3 + $0x60] sm:$0xff] (%p5369_p5), %v4440_v53 }
0x20a0   : > { %v5207_v47 = vpop.eup %5206 }
0x20a1   : > { %v4377_v7 = vsel %vm4370_vm9, %v5207_v47, 0.0 }
0x20a2   : > { %4378 = vadd.xlane.f32.xlu0 %v4377_v7 }
0x212b   : > { %v4379_v48 = vpop.xlane.xlu0 %4378 }
0x212c   : > { %5208 = vrcp.f32 %v4379_v48 }
0x2138   : > { %4393 = sbr.rel (!%p5369_p5) target bundleno = 8509 (0x213d), region = 130 }
0x2139   : > { %v5209_v11 = vpop.eup %5208 }
0x213a   : > { %v4381_v61 = vmul.f32 %v5209_v11, %v5207_v47 }
0x213c   : > { %4382 = vst.msk [vmem:[%s648_s25] sm:$0xff] %vm4370_vm9, %v4381_v61 }
0x213d PF: > { %p26_p11 = scmp.ge.s32.totalorder %s5357_s0, 5   ;;  %s6094_s27 = smov %s5229_s28 }
0x213e   : > { %s6095_s28 = smov %s5367_s20  ;;  %s6096_s29 = smov %s5357_s0 }
0x213f   :  { %28 = sbr.rel (!%p26_p11) target bundleno = 8 (0x8), region = 244 }

</bundles_post_ra>
